<compile_context>
chip_gen: v7x
topology: tpu7x:2x2x1
jax: 0.10.0
libtpu: 0.0.40
codegen_flags: <defaults>
</compile_context>

<pallas_src>
import jax
import jax.numpy as jnp
from jax.experimental import pallas as pl
from jax.experimental.pallas import tpu as pltpu

N_NODES = 16
IN_CH = 2020
HID = 20
OUT_CH = 2
K = 3
NUM_LAYERS = 4
BN_EPS = 1e-5
RES_SCALE = 0.7
CIN_PAD = ((IN_CH + 127) // 128) * 128   # 2048: 128-aligned contraction dim


def _global_gnn_kernel(sw_ref, x_ref, lap_ref, lap2_ref,
                       w0_ref, w1_ref, w2_ref, w3_ref,
                       bias_ref, fcw_ref, fcb_ref, out_ref):
    """One graph per grid step.

    x_ref    : (N, CIN_PAD)   node features, zero-padded channels
    lap_ref  : (N, N)         L_hat  = -D^{-1/2} A D^{-1/2}
    lap2_ref : (N, N)         L2_hat = 2*L_hat@L_hat - I (precomputed)
    w*_ref   : (Cin, 3*HID)   [W0|W1|W2] with the BN scale folded in
    bias_ref : (4, HID)       per-layer BN-folded bias
    fcw_ref  : (HID, OUT_CH)  final Linear weight^T;  fcb_ref: (1, OUT_CH)
    sw_ref   : (1, 4)         softmax(layer weights), precomputed in wrapper
    """
    lap = lap_ref[...]
    lap2 = lap2_ref[...]
    bias = bias_ref[...]

    def cheb_bn_relu(h, w_ref, layer):
        # One long-K MXU pass: Y = h @ [W0|W1|W2]  -> (N, 3*HID).  The weight
        # ref is a direct dot operand (streamed), never materialized + sliced.
        y = jnp.dot(h, w_ref[...], preferred_element_type=jnp.float32)
        # Associativity: Tx1@W1 = L@(h@W1), Tx2@W2 = L2@(h@W2), so the
        # Laplacian matmuls act on (N, HID) instead of (N, Cin).
        pre = (y[:, 0:HID]
               + jnp.dot(lap, y[:, HID:2 * HID],
                         preferred_element_type=jnp.float32)
               + jnp.dot(lap2, y[:, 2 * HID:3 * HID],
                         preferred_element_type=jnp.float32)
               + bias[layer:layer + 1, :])
        return jnp.maximum(pre, 0.0)      # BN folded into W/bias; ReLU

    # dropout(p=0.3) is identity at inference
    h1 = cheb_bn_relu(x_ref[...], w0_ref, 0)
    h2 = cheb_bn_relu(h1, w1_ref, 1) + RES_SCALE * h1
    h3 = cheb_bn_relu(h2, w2_ref, 2) + RES_SCALE * h2
    h4 = cheb_bn_relu(h3, w3_ref, 3) + RES_SCALE * h3

    sw = sw_ref[...]                      # (1, 4) precomputed softmax weights
    emb = (h1 * sw[:, 0:1] + h2 * sw[:, 1:2]
           + h3 * sw[:, 2:3] + h4 * sw[:, 3:4])

    out_ref[...] = (jnp.dot(emb, fcw_ref[...], preferred_element_type=jnp.float32)
                    + fcb_ref[...])


def _fold_params(params):
    """Fold inference BatchNorm into the ChebConv weights/biases, fuse the K=3
    weight matrices into one (Cin, 3*HID) block, precompute softmax(lw)."""
    s = params['gamma'] * jax.lax.rsqrt(params['rvar'] + BN_EPS)        # (4, HID)

    def fuse(w, layer):                                                 # (K, Cin, HID)
        return jnp.concatenate([w[k] * s[layer][None, :] for k in range(K)], axis=1)

    w0f = jnp.pad(fuse(params['w0'], 0), ((0, CIN_PAD - IN_CH), (0, 0)))  # (2048, 60)
    w1f = fuse(params['w1'], 1)                                           # (20, 60)
    w2f = fuse(params['w2'], 2)
    w3f = fuse(params['w3'], 3)
    b_stack = jnp.concatenate(
        [params['b0'], params['b1'], params['b2'], params['b3']], axis=0)  # (4, HID)
    bias = (b_stack - params['rmean']) * s + params['beta']                # (4, HID)
    sw = jax.nn.softmax(params['lw'], axis=-1)                             # (1, 4)
    return w0f, w1f, w2f, w3f, bias, sw


def global_gnn_forward_batched(features_b, lap_b, params):
    """features_b: (G, N, IN_CH), lap_b: (G, N, N) -> (G, N, OUT_CH)."""
    g, n, cin = features_b.shape
    w0f, w1f, w2f, w3f, bias, sw = _fold_params(params)
    x_pad = jnp.pad(features_b, ((0, 0), (0, 0), (0, CIN_PAD - cin)))
    eye = jnp.eye(n, dtype=jnp.float32)
    lap2_b = 2.0 * jnp.einsum('gij,gjk->gik', lap_b, lap_b,
                              precision=jax.lax.Precision.HIGHEST) - eye[None]

    const2d = lambda i: (0, 0)
    per_graph = lambda i: (i, 0, 0)
    in_specs = [
        pl.BlockSpec((1, NUM_LAYERS), const2d),          # sw
        pl.BlockSpec((None, n, CIN_PAD), per_graph),     # x (padded)
        pl.BlockSpec((None, n, n), per_graph),           # lap
        pl.BlockSpec((None, n, n), per_graph),           # lap2
        pl.BlockSpec((CIN_PAD, K * HID), const2d),       # w0 fused
        pl.BlockSpec((HID, K * HID), const2d),           # w1 fused
        pl.BlockSpec((HID, K * HID), const2d),           # w2 fused
        pl.BlockSpec((HID, K * HID), const2d),           # w3 fused
        pl.BlockSpec((NUM_LAYERS, HID), const2d),        # fused biases
        pl.BlockSpec((HID, OUT_CH), const2d),            # fcw
        pl.BlockSpec((1, OUT_CH), const2d),              # fcb
    ]
    return pl.pallas_call(
        _global_gnn_kernel,
        out_shape=jax.ShapeDtypeStruct((g, n, OUT_CH), jnp.float32),
        grid=(g,),
        in_specs=in_specs,
        out_specs=pl.BlockSpec((None, n, OUT_CH), per_graph),
        compiler_params=pltpu.CompilerParams(
            dimension_semantics=("parallel",)),          # shard graphs across TCs
    )(sw, x_pad, lap_b, lap2_b, w0f, w1f, w2f, w3f, bias,
      params['fcw'], params['fcb'])


def global_gnn_forward(features, lap, params):
    """Single-graph forward (matches the PyTorch module interface)."""
    return global_gnn_forward_batched(features[None], lap[None], params)[0]


def scaled_laplacian_dense(edges, num_nodes):
    """L_hat = 2L/lambda_max - I with lambda_max=2 and sym normalization
       => L_hat = -D^{-1/2} A D^{-1/2} (self loops removed)."""
    row, col = edges
    adj = jnp.zeros((num_nodes, num_nodes), jnp.float32).at[row, col].add(1.0)
    adj = adj * (1.0 - jnp.eye(num_nodes, dtype=jnp.float32))      # remove self loops
    deg = adj.sum(axis=1)
    dinv = jnp.where(deg > 0, deg ** -0.5, 0.0)
    a_norm = dinv[:, None] * adj * dinv[None, :]
    return -a_norm


def reference_forward(features, lap, params):
    """Pure-JAX mirror of the PyTorch forward (original, unfolded params)."""
    hp = jax.lax.Precision.HIGHEST

    def cheb(h, w, b):
        tx0 = h
        tx1 = jnp.dot(lap, h, precision=hp)
        out = jnp.dot(tx0, w[0], precision=hp) + jnp.dot(tx1, w[1], precision=hp)
        tx2 = 2.0 * jnp.dot(lap, tx1, precision=hp) - tx0
        return out + jnp.dot(tx2, w[2], precision=hp) + b

    def bn(h, i):
        return ((h - params['rmean'][i:i + 1])
                * jax.lax.rsqrt(params['rvar'][i:i + 1] + BN_EPS)
                * params['gamma'][i:i + 1] + params['beta'][i:i + 1])

    h1 = jax.nn.relu(bn(cheb(features, params['w0'], params['b0']), 0))
    h2 = jax.nn.relu(bn(cheb(h1, params['w1'], params['b1']), 1)) + RES_SCALE * h1
    h3 = jax.nn.relu(bn(cheb(h2, params['w2'], params['b2']), 2)) + RES_SCALE * h2
    h4 = jax.nn.relu(bn(cheb(h3, params['w3'], params['b3']), 3)) + RES_SCALE * h3
    w = jax.nn.softmax(params['lw'], axis=-1)
    emb = (h1 * w[:, 0:1] + h2 * w[:, 1:2] + h3 * w[:, 2:3] + h4 * w[:, 3:4])
    return jnp.dot(emb, params['fcw'], precision=hp) + params['fcb']


if __name__ == "__main__":
    key = jax.random.PRNGKey(0)
    ks = jax.random.split(key, 17)

    features = jax.random.normal(ks[0], (N_NODES, IN_CH), jnp.float32)

    # Small symmetric graph: ring + chords (undirected -> both directions listed).
    src = jnp.arange(N_NODES)
    dst1 = (src + 1) % N_NODES
    dst2 = (src + 5) % N_NODES
    row = jnp.concatenate([src, dst1, src, dst2])
    col = jnp.concatenate([dst1, src, dst2, src])
    edges = jnp.stack([row, col]).astype(jnp.int32)          # (2, 64)
    edge_weight = jnp.ones((edges.shape[1],), jnp.float32)   # unused (parity with torch signature)

    lap = scaled_laplacian_dense(edges, N_NODES)

    def nrm(k, shape, scale=0.1):
        return (scale * jax.random.normal(k, shape)).astype(jnp.float32)

    params = dict(
        w0=nrm(ks[1], (K, IN_CH, HID), 0.05),
        b0=nrm(ks[2], (1, HID)),
        w1=nrm(ks[3], (K, HID, HID)),
        b1=nrm(ks[4], (1, HID)),
        w2=nrm(ks[5], (K, HID, HID)),
        b2=nrm(ks[6], (1, HID)),
        w3=nrm(ks[7], (K, HID, HID)),
        b3=nrm(ks[8], (1, HID)),
        gamma=(1.0 + nrm(ks[9], (NUM_LAYERS, HID))).astype(jnp.float32),
        beta=nrm(ks[10], (NUM_LAYERS, HID)),
        rmean=nrm(ks[11], (NUM_LAYERS, HID)),
        rvar=(1.0 + 0.1 * jnp.abs(jax.random.normal(ks[12], (NUM_LAYERS, HID)))).astype(jnp.float32),
        fcw=nrm(ks[13], (HID, OUT_CH)),      # = torch Linear weight^T
        fcb=nrm(ks[14], (1, OUT_CH)),
        lw=nrm(ks[15], (1, NUM_LAYERS), 1.0),
    )

    # --- single-graph forward (semantics of the PyTorch module) ---
    out = jax.block_until_ready(global_gnn_forward(features, lap, params))
    ref = reference_forward(features, lap, params)
    assert out.shape == (N_NODES, OUT_CH), out.shape
    assert jnp.allclose(out, ref, rtol=1e-3, atol=1e-3), (out, ref)

    # --- batched forward: many graphs in one pallas_call, parallel grid ---
    G = 8
    feats_b = jax.random.normal(ks[16], (G, N_NODES, IN_CH), jnp.float32)
    lap_b = jnp.broadcast_to(lap, (G, N_NODES, N_NODES))
    out_b = jax.block_until_ready(global_gnn_forward_batched(feats_b, lap_b, params))
    ref_b = jax.vmap(lambda f, l: reference_forward(f, l, params))(feats_b, lap_b)
    assert out_b.shape == (G, N_NODES, OUT_CH), out_b.shape
    assert jnp.allclose(out_b, ref_b, rtol=1e-3, atol=1e-3)

    print("KERNEL_OK")
</pallas_src>

<mosaic_0001>
module attributes {stable_mosaic.version = 11 : i64} {
  func.func @_global_gnn_kernel(%arg0: i32, %arg1: memref<1x4xf32, #tpu.memory_space<vmem>>, %arg2: memref<1x16x2048xf32, #tpu.memory_space<vmem>>, %arg3: memref<1x16x16xf32, #tpu.memory_space<vmem>>, %arg4: memref<1x16x16xf32, #tpu.memory_space<vmem>>, %arg5: memref<2048x60xf32, #tpu.memory_space<vmem>>, %arg6: memref<20x60xf32, #tpu.memory_space<vmem>>, %arg7: memref<20x60xf32, #tpu.memory_space<vmem>>, %arg8: memref<20x60xf32, #tpu.memory_space<vmem>>, %arg9: memref<4x20xf32, #tpu.memory_space<vmem>>, %arg10: memref<20x2xf32, #tpu.memory_space<vmem>>, %arg11: memref<1x2xf32, #tpu.memory_space<vmem>>, %arg12: memref<1x16x2xf32, #tpu.memory_space<vmem>>) attributes {dimension_semantics = [#tpu.dimension_semantics<parallel>], iteration_bounds = array<i64: 1>, scalar_prefetch = 0 : i64, scratch_operands = 0 : i64, tpu.core_type = #tpu.core_type<tc>, window_params = [{pipeline_mode = #tpu.pipeline_mode<synchronous>, transform_indices = @transform_0, window_bounds = array<i64: 1, 4>}, {transform_indices = @transform_1, window_bounds = array<i64: 1, 16, 2048>}, {transform_indices = @transform_2, window_bounds = array<i64: 1, 16, 16>}, {transform_indices = @transform_3, window_bounds = array<i64: 1, 16, 16>}, {pipeline_mode = #tpu.pipeline_mode<synchronous>, transform_indices = @transform_4, window_bounds = array<i64: 2048, 60>}, {pipeline_mode = #tpu.pipeline_mode<synchronous>, transform_indices = @transform_5, window_bounds = array<i64: 20, 60>}, {pipeline_mode = #tpu.pipeline_mode<synchronous>, transform_indices = @transform_6, window_bounds = array<i64: 20, 60>}, {pipeline_mode = #tpu.pipeline_mode<synchronous>, transform_indices = @transform_7, window_bounds = array<i64: 20, 60>}, {pipeline_mode = #tpu.pipeline_mode<synchronous>, transform_indices = @transform_8, window_bounds = array<i64: 4, 20>}, {pipeline_mode = #tpu.pipeline_mode<synchronous>, transform_indices = @transform_9, window_bounds = array<i64: 20, 2>}, {pipeline_mode = #tpu.pipeline_mode<synchronous>, transform_indices = @transform_10, window_bounds = array<i64: 1, 2>}, {transform_indices = @transform_11, window_bounds = array<i64: 1, 16, 2>}]} {
    %c0 = arith.constant 0 : index
    %c0_0 = arith.constant 0 : index
    %c0_1 = arith.constant 0 : index
    %0 = vector.load %arg3[%c0, %c0_0, %c0_1] : memref<1x16x16xf32, #tpu.memory_space<vmem>>, vector<1x16x16xf32>
    %1 = vector.shape_cast %0 : vector<1x16x16xf32> to vector<16x16xf32>
    %c0_2 = arith.constant 0 : index
    %c0_3 = arith.constant 0 : index
    %c0_4 = arith.constant 0 : index
    %2 = vector.load %arg4[%c0_2, %c0_3, %c0_4] : memref<1x16x16xf32, #tpu.memory_space<vmem>>, vector<1x16x16xf32>
    %3 = vector.shape_cast %2 : vector<1x16x16xf32> to vector<16x16xf32>
    %c0_5 = arith.constant 0 : index
    %c0_6 = arith.constant 0 : index
    %4 = vector.load %arg9[%c0_5, %c0_6] : memref<4x20xf32, #tpu.memory_space<vmem>>, vector<4x20xf32>
    %c0_7 = arith.constant 0 : index
    %c0_8 = arith.constant 0 : index
    %c0_9 = arith.constant 0 : index
    %5 = vector.load %arg2[%c0_7, %c0_8, %c0_9] : memref<1x16x2048xf32, #tpu.memory_space<vmem>>, vector<1x16x2048xf32>
    %6 = vector.shape_cast %5 : vector<1x16x2048xf32> to vector<16x2048xf32>
    %c0_10 = arith.constant 0 : index
    %c0_11 = arith.constant 0 : index
    %7 = vector.load %arg5[%c0_10, %c0_11] : memref<2048x60xf32, #tpu.memory_space<vmem>>, vector<2048x60xf32>
    %cst = arith.constant dense<0.000000e+00> : vector<16x60xf32>
    %8 = tpu.matmul %6, %7, %cst {dimension_numbers = #tpu.dot_dimension_numbers<[1], [0], [0], [1], [0, 0, 1, 1], [], []>} : vector<16x2048xf32>, vector<2048x60xf32>, vector<16x60xf32> -> vector<16x60xf32>
    %9 = vector.extract_strided_slice %8 {offsets = [0, 0], sizes = [16, 20], strides = [1, 1]} : vector<16x60xf32> to vector<16x20xf32>
    %10 = vector.extract_strided_slice %8 {offsets = [0, 20], sizes = [16, 20], strides = [1, 1]} : vector<16x60xf32> to vector<16x20xf32>
    %cst_12 = arith.constant dense<0.000000e+00> : vector<16x20xf32>
    %11 = tpu.matmul %1, %10, %cst_12 {dimension_numbers = #tpu.dot_dimension_numbers<[1], [0], [0], [1], [0, 0, 1, 1], [], []>} : vector<16x16xf32>, vector<16x20xf32>, vector<16x20xf32> -> vector<16x20xf32>
    %12 = arith.addf %9, %11 : vector<16x20xf32>
    %13 = vector.extract_strided_slice %8 {offsets = [0, 40], sizes = [16, 20], strides = [1, 1]} : vector<16x60xf32> to vector<16x20xf32>
    %cst_13 = arith.constant dense<0.000000e+00> : vector<16x20xf32>
    %14 = tpu.matmul %3, %13, %cst_13 {dimension_numbers = #tpu.dot_dimension_numbers<[1], [0], [0], [1], [0, 0, 1, 1], [], []>} : vector<16x16xf32>, vector<16x20xf32>, vector<16x20xf32> -> vector<16x20xf32>
    %15 = arith.addf %12, %14 : vector<16x20xf32>
    %16 = vector.extract_strided_slice %4 {offsets = [0, 0], sizes = [1, 20], strides = [1, 1]} : vector<4x20xf32> to vector<1x20xf32>
    %17 = vector.broadcast %16 : vector<1x20xf32> to vector<16x20xf32>
    %18 = arith.addf %15, %17 : vector<16x20xf32>
    %cst_14 = arith.constant 0.000000e+00 : f32
    %19 = vector.broadcast %cst_14 : f32 to vector<16x20xf32>
    %20 = arith.maximumf %18, %19 : vector<16x20xf32>
    %c0_15 = arith.constant 0 : index
    %c0_16 = arith.constant 0 : index
    %21 = vector.load %arg6[%c0_15, %c0_16] : memref<20x60xf32, #tpu.memory_space<vmem>>, vector<20x60xf32>
    %cst_17 = arith.constant dense<0.000000e+00> : vector<16x60xf32>
    %22 = tpu.matmul %20, %21, %cst_17 {dimension_numbers = #tpu.dot_dimension_numbers<[1], [0], [0], [1], [0, 0, 1, 1], [], []>} : vector<16x20xf32>, vector<20x60xf32>, vector<16x60xf32> -> vector<16x60xf32>
    %23 = vector.extract_strided_slice %22 {offsets = [0, 0], sizes = [16, 20], strides = [1, 1]} : vector<16x60xf32> to vector<16x20xf32>
    %24 = vector.extract_strided_slice %22 {offsets = [0, 20], sizes = [16, 20], strides = [1, 1]} : vector<16x60xf32> to vector<16x20xf32>
    %cst_18 = arith.constant dense<0.000000e+00> : vector<16x20xf32>
    %25 = tpu.matmul %1, %24, %cst_18 {dimension_numbers = #tpu.dot_dimension_numbers<[1], [0], [0], [1], [0, 0, 1, 1], [], []>} : vector<16x16xf32>, vector<16x20xf32>, vector<16x20xf32> -> vector<16x20xf32>
    %26 = arith.addf %23, %25 : vector<16x20xf32>
    %27 = vector.extract_strided_slice %22 {offsets = [0, 40], sizes = [16, 20], strides = [1, 1]} : vector<16x60xf32> to vector<16x20xf32>
    %cst_19 = arith.constant dense<0.000000e+00> : vector<16x20xf32>
    %28 = tpu.matmul %3, %27, %cst_19 {dimension_numbers = #tpu.dot_dimension_numbers<[1], [0], [0], [1], [0, 0, 1, 1], [], []>} : vector<16x16xf32>, vector<16x20xf32>, vector<16x20xf32> -> vector<16x20xf32>
    %29 = arith.addf %26, %28 : vector<16x20xf32>
    %30 = vector.extract_strided_slice %4 {offsets = [1, 0], sizes = [1, 20], strides = [1, 1]} : vector<4x20xf32> to vector<1x20xf32>
    %31 = vector.broadcast %30 : vector<1x20xf32> to vector<16x20xf32>
    %32 = arith.addf %29, %31 : vector<16x20xf32>
    %cst_20 = arith.constant 0.000000e+00 : f32
    %33 = vector.broadcast %cst_20 : f32 to vector<16x20xf32>
    %34 = arith.maximumf %32, %33 : vector<16x20xf32>
    %cst_21 = arith.constant 0.699999988 : f32
    %35 = vector.broadcast %cst_21 : f32 to vector<16x20xf32>
    %36 = arith.mulf %35, %20 : vector<16x20xf32>
    %37 = arith.addf %34, %36 : vector<16x20xf32>
    %c0_22 = arith.constant 0 : index
    %c0_23 = arith.constant 0 : index
    %38 = vector.load %arg7[%c0_22, %c0_23] : memref<20x60xf32, #tpu.memory_space<vmem>>, vector<20x60xf32>
    %cst_24 = arith.constant dense<0.000000e+00> : vector<16x60xf32>
    %39 = tpu.matmul %37, %38, %cst_24 {dimension_numbers = #tpu.dot_dimension_numbers<[1], [0], [0], [1], [0, 0, 1, 1], [], []>} : vector<16x20xf32>, vector<20x60xf32>, vector<16x60xf32> -> vector<16x60xf32>
    %40 = vector.extract_strided_slice %39 {offsets = [0, 0], sizes = [16, 20], strides = [1, 1]} : vector<16x60xf32> to vector<16x20xf32>
    %41 = vector.extract_strided_slice %39 {offsets = [0, 20], sizes = [16, 20], strides = [1, 1]} : vector<16x60xf32> to vector<16x20xf32>
    %cst_25 = arith.constant dense<0.000000e+00> : vector<16x20xf32>
    %42 = tpu.matmul %1, %41, %cst_25 {dimension_numbers = #tpu.dot_dimension_numbers<[1], [0], [0], [1], [0, 0, 1, 1], [], []>} : vector<16x16xf32>, vector<16x20xf32>, vector<16x20xf32> -> vector<16x20xf32>
    %43 = arith.addf %40, %42 : vector<16x20xf32>
    %44 = vector.extract_strided_slice %39 {offsets = [0, 40], sizes = [16, 20], strides = [1, 1]} : vector<16x60xf32> to vector<16x20xf32>
    %cst_26 = arith.constant dense<0.000000e+00> : vector<16x20xf32>
    %45 = tpu.matmul %3, %44, %cst_26 {dimension_numbers = #tpu.dot_dimension_numbers<[1], [0], [0], [1], [0, 0, 1, 1], [], []>} : vector<16x16xf32>, vector<16x20xf32>, vector<16x20xf32> -> vector<16x20xf32>
    %46 = arith.addf %43, %45 : vector<16x20xf32>
    %47 = vector.extract_strided_slice %4 {offsets = [2, 0], sizes = [1, 20], strides = [1, 1]} : vector<4x20xf32> to vector<1x20xf32>
    %48 = vector.broadcast %47 : vector<1x20xf32> to vector<16x20xf32>
    %49 = arith.addf %46, %48 : vector<16x20xf32>
    %cst_27 = arith.constant 0.000000e+00 : f32
    %50 = vector.broadcast %cst_27 : f32 to vector<16x20xf32>
    %51 = arith.maximumf %49, %50 : vector<16x20xf32>
    %cst_28 = arith.constant 0.699999988 : f32
    %52 = vector.broadcast %cst_28 : f32 to vector<16x20xf32>
    %53 = arith.mulf %52, %37 : vector<16x20xf32>
    %54 = arith.addf %51, %53 : vector<16x20xf32>
    %c0_29 = arith.constant 0 : index
    %c0_30 = arith.constant 0 : index
    %55 = vector.load %arg8[%c0_29, %c0_30] : memref<20x60xf32, #tpu.memory_space<vmem>>, vector<20x60xf32>
    %cst_31 = arith.constant dense<0.000000e+00> : vector<16x60xf32>
    %56 = tpu.matmul %54, %55, %cst_31 {dimension_numbers = #tpu.dot_dimension_numbers<[1], [0], [0], [1], [0, 0, 1, 1], [], []>} : vector<16x20xf32>, vector<20x60xf32>, vector<16x60xf32> -> vector<16x60xf32>
    %57 = vector.extract_strided_slice %56 {offsets = [0, 0], sizes = [16, 20], strides = [1, 1]} : vector<16x60xf32> to vector<16x20xf32>
    %58 = vector.extract_strided_slice %56 {offsets = [0, 20], sizes = [16, 20], strides = [1, 1]} : vector<16x60xf32> to vector<16x20xf32>
    %cst_32 = arith.constant dense<0.000000e+00> : vector<16x20xf32>
    %59 = tpu.matmul %1, %58, %cst_32 {dimension_numbers = #tpu.dot_dimension_numbers<[1], [0], [0], [1], [0, 0, 1, 1], [], []>} : vector<16x16xf32>, vector<16x20xf32>, vector<16x20xf32> -> vector<16x20xf32>
    %60 = arith.addf %57, %59 : vector<16x20xf32>
    %61 = vector.extract_strided_slice %56 {offsets = [0, 40], sizes = [16, 20], strides = [1, 1]} : vector<16x60xf32> to vector<16x20xf32>
    %cst_33 = arith.constant dense<0.000000e+00> : vector<16x20xf32>
    %62 = tpu.matmul %3, %61, %cst_33 {dimension_numbers = #tpu.dot_dimension_numbers<[1], [0], [0], [1], [0, 0, 1, 1], [], []>} : vector<16x16xf32>, vector<16x20xf32>, vector<16x20xf32> -> vector<16x20xf32>
    %63 = arith.addf %60, %62 : vector<16x20xf32>
    %64 = vector.extract_strided_slice %4 {offsets = [3, 0], sizes = [1, 20], strides = [1, 1]} : vector<4x20xf32> to vector<1x20xf32>
    %65 = vector.broadcast %64 : vector<1x20xf32> to vector<16x20xf32>
    %66 = arith.addf %63, %65 : vector<16x20xf32>
    %cst_34 = arith.constant 0.000000e+00 : f32
    %67 = vector.broadcast %cst_34 : f32 to vector<16x20xf32>
    %68 = arith.maximumf %66, %67 : vector<16x20xf32>
    %cst_35 = arith.constant 0.699999988 : f32
    %69 = vector.broadcast %cst_35 : f32 to vector<16x20xf32>
    %70 = arith.mulf %69, %54 : vector<16x20xf32>
    %71 = arith.addf %68, %70 : vector<16x20xf32>
    %c0_36 = arith.constant 0 : index
    %c0_37 = arith.constant 0 : index
    %72 = vector.load %arg1[%c0_36, %c0_37] : memref<1x4xf32, #tpu.memory_space<vmem>>, vector<1x4xf32>
    %73 = vector.extract_strided_slice %72 {offsets = [0, 0], sizes = [1, 1], strides = [1, 1]} : vector<1x4xf32> to vector<1x1xf32>
    %74 = vector.broadcast %73 : vector<1x1xf32> to vector<16x20xf32>
    %75 = arith.mulf %20, %74 : vector<16x20xf32>
    %76 = vector.extract_strided_slice %72 {offsets = [0, 1], sizes = [1, 1], strides = [1, 1]} : vector<1x4xf32> to vector<1x1xf32>
    %77 = vector.broadcast %76 : vector<1x1xf32> to vector<16x20xf32>
    %78 = arith.mulf %37, %77 : vector<16x20xf32>
    %79 = arith.addf %75, %78 : vector<16x20xf32>
    %80 = vector.extract_strided_slice %72 {offsets = [0, 2], sizes = [1, 1], strides = [1, 1]} : vector<1x4xf32> to vector<1x1xf32>
    %81 = vector.broadcast %80 : vector<1x1xf32> to vector<16x20xf32>
    %82 = arith.mulf %54, %81 : vector<16x20xf32>
    %83 = arith.addf %79, %82 : vector<16x20xf32>
    %84 = vector.extract_strided_slice %72 {offsets = [0, 3], sizes = [1, 1], strides = [1, 1]} : vector<1x4xf32> to vector<1x1xf32>
    %85 = vector.broadcast %84 : vector<1x1xf32> to vector<16x20xf32>
    %86 = arith.mulf %71, %85 : vector<16x20xf32>
    %87 = arith.addf %83, %86 : vector<16x20xf32>
    %c0_38 = arith.constant 0 : index
    %c0_39 = arith.constant 0 : index
    %88 = vector.load %arg10[%c0_38, %c0_39] : memref<20x2xf32, #tpu.memory_space<vmem>>, vector<20x2xf32>
    %cst_40 = arith.constant dense<0.000000e+00> : vector<16x2xf32>
    %89 = tpu.matmul %87, %88, %cst_40 {dimension_numbers = #tpu.dot_dimension_numbers<[1], [0], [0], [1], [0, 0, 1, 1], [], []>} : vector<16x20xf32>, vector<20x2xf32>, vector<16x2xf32> -> vector<16x2xf32>
    %c0_41 = arith.constant 0 : index
    %c0_42 = arith.constant 0 : index
    %90 = vector.load %arg11[%c0_41, %c0_42] : memref<1x2xf32, #tpu.memory_space<vmem>>, vector<1x2xf32>
    %91 = vector.broadcast %90 : vector<1x2xf32> to vector<16x2xf32>
    %92 = arith.addf %89, %91 : vector<16x2xf32>
    %c0_43 = arith.constant 0 : index
    %c0_44 = arith.constant 0 : index
    %c0_45 = arith.constant 0 : index
    %93 = vector.load %arg12[%c0_43, %c0_44, %c0_45] : memref<1x16x2xf32, #tpu.memory_space<vmem>>, vector<1x16x2xf32>
    %94 = vector.shape_cast %93 : vector<1x16x2xf32> to vector<16x2xf32>
    %95 = vector.shape_cast %92 : vector<16x2xf32> to vector<1x16x2xf32>
    tpu.vector_store %arg12[%c0_43, %c0_44, %c0_45], %95 {strides = array<i32>} : memref<1x16x2xf32, #tpu.memory_space<vmem>>, vector<1x16x2xf32>,
    return
  }
  func.func @transform_0(%arg0: i32) -> (i32, i32) {
    %c0_i32 = arith.constant 0 : i32
    %c0_i32_0 = arith.constant 0 : i32
    %c0_i32_1 = arith.constant 0 : i32
    return %c0_i32, %c0_i32_0 : i32, i32
  }
  func.func @transform_1(%arg0: i32) -> (i32, i32, i32) {
    %c0_i32 = arith.constant 0 : i32
    %c0_i32_0 = arith.constant 0 : i32
    %c0_i32_1 = arith.constant 0 : i32
    return %arg0, %c0_i32, %c0_i32_0 : i32, i32, i32
  }
  func.func @transform_2(%arg0: i32) -> (i32, i32, i32) {
    %c0_i32 = arith.constant 0 : i32
    %c0_i32_0 = arith.constant 0 : i32
    %c0_i32_1 = arith.constant 0 : i32
    return %arg0, %c0_i32, %c0_i32_0 : i32, i32, i32
  }
  func.func @transform_3(%arg0: i32) -> (i32, i32, i32) {
    %c0_i32 = arith.constant 0 : i32
    %c0_i32_0 = arith.constant 0 : i32
    %c0_i32_1 = arith.constant 0 : i32
    return %arg0, %c0_i32, %c0_i32_0 : i32, i32, i32
  }
  func.func @transform_4(%arg0: i32) -> (i32, i32) {
    %c0_i32 = arith.constant 0 : i32
    %c0_i32_0 = arith.constant 0 : i32
    %c0_i32_1 = arith.constant 0 : i32
    return %c0_i32, %c0_i32_0 : i32, i32
  }
  func.func @transform_5(%arg0: i32) -> (i32, i32) {
    %c0_i32 = arith.constant 0 : i32
    %c0_i32_0 = arith.constant 0 : i32
    %c0_i32_1 = arith.constant 0 : i32
    return %c0_i32, %c0_i32_0 : i32, i32
  }
  func.func @transform_6(%arg0: i32) -> (i32, i32) {
    %c0_i32 = arith.constant 0 : i32
    %c0_i32_0 = arith.constant 0 : i32
    %c0_i32_1 = arith.constant 0 : i32
    return %c0_i32, %c0_i32_0 : i32, i32
  }
  func.func @transform_7(%arg0: i32) -> (i32, i32) {
    %c0_i32 = arith.constant 0 : i32
    %c0_i32_0 = arith.constant 0 : i32
    %c0_i32_1 = arith.constant 0 : i32
    return %c0_i32, %c0_i32_0 : i32, i32
  }
  func.func @transform_8(%arg0: i32) -> (i32, i32) {
    %c0_i32 = arith.constant 0 : i32
    %c0_i32_0 = arith.constant 0 : i32
    %c0_i32_1 = arith.constant 0 : i32
    return %c0_i32, %c0_i32_0 : i32, i32
  }
  func.func @transform_9(%arg0: i32) -> (i32, i32) {
    %c0_i32 = arith.constant 0 : i32
    %c0_i32_0 = arith.constant 0 : i32
    %c0_i32_1 = arith.constant 0 : i32
    return %c0_i32, %c0_i32_0 : i32, i32
  }
  func.func @transform_10(%arg0: i32) -> (i32, i32) {
    %c0_i32 = arith.constant 0 : i32
    %c0_i32_0 = arith.constant 0 : i32
    %c0_i32_1 = arith.constant 0 : i32
    return %c0_i32, %c0_i32_0 : i32, i32
  }
  func.func @transform_11(%arg0: i32) -> (i32, i32, i32) {
    %c0_i32 = arith.constant 0 : i32
    %c0_i32_0 = arith.constant 0 : i32
    %c0_i32_1 = arith.constant 0 : i32
    return %arg0, %c0_i32, %c0_i32_0 : i32, i32, i32
  }
}

</mosaic_0001>

<bundles_post_ra>
// kernel: tpu_custom_call.1
= control target key start
LH: loop header
LB: loop body
LE: loop exit
PB: predicated region body
PF: predicated region fallthrough
CT: control target
= control target key end

     0   :  { %vm939_vm0 = vcmask 130048   ;;  %s2908_s23 = smov 108   ;;  %s2909_s24 = smov 88   ;;  %vm1130_vm1 = vcmask 1043456   ;;  %vm1123_vm2 = vcmask 162816   ;;  %vm2053_vm3 = vcmask 15360   ;;  %s4007_s4 = inlined_call_operand.vmem [shape: f32[2048,60], index: 4, kind: input, shape index: {}]   ;;  %s4008_s1 = inlined_call_operand.vmem [shape: f32[1,16,2048], index: 1, kind: input, shape index: {}]   ;;  %s4009_s2 = inlined_call_operand.vmem [shape: f32[1,16,16], index: 2, kind: input, shape index: {}]   ;;  %s4010_s3 = inlined_call_operand.vmem [shape: f32[1,16,16], index: 3, kind: input, shape index: {}]   ;;  %s4011_s5 = inlined_call_operand.vmem [shape: f32[20,60], index: 5, kind: input, shape index: {}]   ;;  %s4012_s8 = inlined_call_operand.vmem [shape: f32[4,20], index: 8, kind: input, shape index: {}]   ;;  %s4013_s6 = inlined_call_operand.vmem [shape: f32[20,60], index: 6, kind: input, shape index: {}]   ;;  %s4014_s7 = inlined_call_operand.vmem [shape: f32[20,60], index: 7, kind: input, shape index: {}]   ;;  %s4015_s0 = inlined_call_operand.vmem [shape: f32[1,4], index: 0, kind: input, shape index: {}]   ;;  %s4016_s9 = inlined_call_operand.vmem [shape: f32[20,2], index: 9, kind: input, shape index: {}]   ;;  %s4017_s10 = inlined_call_operand.vmem [shape: f32[1,2], index: 10, kind: input, shape index: {}]   ;;  %s4018_s11 = inlined_call_operand.vmem [shape: f32[1,16,2], index: 11, kind: output, shape index: {}]  }
   0x1   :  { %v91_v0 = vld [vmem:[%s4007_s4 + $0x80] sm:$0xff]  ;;  %v92_v1 = vld [vmem:[%s4007_s4 + $0x88] sm:$0xff]  ;;  %v93_v11 = vld [vmem:[%s4007_s4 + $0x90] sm:$0xff] }
   0x2   :  { %v123_v2 = vld [vmem:[%s4007_s4 + $0x180] sm:$0xff]  ;;  %v2538_v3 = vpack.c.bf16 %v92_v1, %v91_v0  ;;  %v124_v4 = vld [vmem:[%s4007_s4 + $0x188] sm:$0xff]  ;;  %v94_v13 = vld [vmem:[%s4007_s4 + $0x98] sm:$0xff] }
   0x3   :  { %v75_v5 = vld [vmem:[%s4007_s4] sm:$0xff]  ;;  %v76_v6 = vld [vmem:[%s4007_s4 + $0x8] sm:$0xff]  ;;  %v2570_v7 = vpack.c.bf16 %v124_v4, %v123_v2  ;;  %v125_v14 = vld [vmem:[%s4007_s4 + $0x190] sm:$0xff]  ;;  %v2542_v16 = vpack.c.bf16 %v94_v13, %v93_v11 }
   0x4   :  { %v2540_v8 = vpack.c.bf16 %v76_v6, %v75_v5  ;;  %v107_v9 = vld [vmem:[%s4007_s4 + $0x100] sm:$0xff]  ;;  %v108_v10 = vld [vmem:[%s4007_s4 + $0x108] sm:$0xff]  ;;  %2539 = vmatprep.subr.bf16.mxu0 %v2538_v3  ;;  %v126_v15 = vld [vmem:[%s4007_s4 + $0x198] sm:$0xff] }
   0x5   :  { %v2572_v12 = vpack.c.bf16 %v108_v10, %v107_v9  ;;  %2571 = vmatprep.subr.bf16.mxu1 %v2570_v7  ;;  %v2574_v17 = vpack.c.bf16 %v126_v15, %v125_v14  ;;  %v77_v18 = vld [vmem:[%s4007_s4 + $0x10] sm:$0xff]  ;;  %v78_v19 = vld [vmem:[%s4007_s4 + $0x18] sm:$0xff]  ;;  %v95_v23 = vld [vmem:[%s4007_s4 + $0xa0] sm:$0xff] }
   0x6   :  { %2541 = vmatpush3.bf16.msra.mxu0 %v2540_v8  ;;  %v109_v20 = vld [vmem:[%s4007_s4 + $0x110] sm:$0xff]  ;;  %v2544_v21 = vpack.c.bf16 %v78_v19, %v77_v18  ;;  %v110_v22 = vld [vmem:[%s4007_s4 + $0x118] sm:$0xff]  ;;  %v96_v24 = vld [vmem:[%s4007_s4 + $0xa8] sm:$0xff] }
   0x7   :  { %2573 = vmatpush3.bf16.msra.mxu1 %v2572_v12  ;;  %2543 = vmatprep.subr.bf16.mxu0 %v2542_v16  ;;  %v2576_v25 = vpack.c.bf16 %v110_v22, %v109_v20  ;;  %v2546_v26 = vpack.c.bf16 %v96_v24, %v95_v23  ;;  %v127_v27 = vld [vmem:[%s4007_s4 + $0x1a0] sm:$0xff]  ;;  %v128_v28 = vld [vmem:[%s4007_s4 + $0x1a8] sm:$0xff]  ;;  %v97_v35 = vld [vmem:[%s4007_s4 + $0xb0] sm:$0xff] }
   0x8   :  { %2575 = vmatprep.subr.bf16.mxu1 %v2574_v17  ;;  %v79_v29 = vld [vmem:[%s4007_s4 + $0x20] sm:$0xff]  ;;  %v2578_v30 = vpack.c.bf16 %v128_v28, %v127_v27  ;;  %v80_v31 = vld [vmem:[%s4007_s4 + $0x28] sm:$0xff]  ;;  %v98_v36 = vld [vmem:[%s4007_s4 + $0xb8] sm:$0xff] }
   0x9   :  { %v111_v32 = vld [vmem:[%s4007_s4 + $0x120] sm:$0xff]  ;;  %v112_v33 = vld [vmem:[%s4007_s4 + $0x128] sm:$0xff]  ;;  %v2548_v34 = vpack.c.bf16 %v80_v31, %v79_v29  ;;  %v129_v37 = vld [vmem:[%s4007_s4 + $0x1b0] sm:$0xff]  ;;  %v2550_v39 = vpack.c.bf16 %v98_v36, %v97_v35 }
   0xa   :  { %2545 = vmatpush3.bf16.msra.mxu0 %v2544_v21  ;;  %v2580_v38 = vpack.c.bf16 %v112_v33, %v111_v32  ;;  %v130_v40 = vld [vmem:[%s4007_s4 + $0x1b8] sm:$0xff]  ;;  %v81_v41 = vld [vmem:[%s4007_s4 + $0x30] sm:$0xff]  ;;  %v99_v46 = vld [vmem:[%s4007_s4 + $0xc0] sm:$0xff] }
   0xb   :  { %2577 = vmatpush3.bf16.msra.mxu1 %v2576_v25  ;;  %2547 = vmatprep.subr.bf16.mxu0 %v2546_v26  ;;  %v82_v42 = vld [vmem:[%s4007_s4 + $0x38] sm:$0xff]  ;;  %v2582_v43 = vpack.c.bf16 %v130_v40, %v129_v37  ;;  %v113_v44 = vld [vmem:[%s4007_s4 + $0x130] sm:$0xff]  ;;  %v100_v47 = vld [vmem:[%s4007_s4 + $0xc8] sm:$0xff] }
   0xc   :  { %2579 = vmatprep.subr.bf16.mxu1 %v2578_v30  ;;  %v114_v45 = vld [vmem:[%s4007_s4 + $0x138] sm:$0xff]  ;;  %v131_v48 = vld [vmem:[%s4007_s4 + $0x1c0] sm:$0xff]  ;;  %v132_v49 = vld [vmem:[%s4007_s4 + $0x1c8] sm:$0xff]  ;;  %v2552_v50 = vpack.c.bf16 %v82_v42, %v81_v41  ;;  %v2554_v52 = vpack.c.bf16 %v100_v47, %v99_v46 }
   0xd   :  { %v2584_v51 = vpack.c.bf16 %v114_v45, %v113_v44  ;;  %v83_v53 = vld [vmem:[%s4007_s4 + $0x40] sm:$0xff]  ;;  %v84_v54 = vld [vmem:[%s4007_s4 + $0x48] sm:$0xff]  ;;  %v2586_v56 = vpack.c.bf16 %v132_v49, %v131_v48  ;;  %v101_v58 = vld [vmem:[%s4007_s4 + $0xd0] sm:$0xff] }
   0xe   :  { %2549 = vmatpush3.bf16.msra.mxu0 %v2548_v34  ;;  %v115_v55 = vld [vmem:[%s4007_s4 + $0x140] sm:$0xff]  ;;  %v116_v57 = vld [vmem:[%s4007_s4 + $0x148] sm:$0xff]  ;;  %v102_v59 = vld [vmem:[%s4007_s4 + $0xd8] sm:$0xff]  ;;  %v2556_v62 = vpack.c.bf16 %v84_v54, %v83_v53 }
   0xf   :  { %2581 = vmatpush3.bf16.msra.mxu1 %v2580_v38  ;;  %2551 = vmatprep.subr.bf16.mxu0 %v2550_v39  ;;  %v133_v60 = vld [vmem:[%s4007_s4 + $0x1d0] sm:$0xff]  ;;  %v134_v61 = vld [vmem:[%s4007_s4 + $0x1d8] sm:$0xff]  ;;  %v2588_v63 = vpack.c.bf16 %v116_v57, %v115_v55  ;;  %v2558_v0 = vpack.c.bf16 %v102_v59, %v101_v58  ;;  %v103_v6 = vld [vmem:[%s4007_s4 + $0xe0] sm:$0xff] }
  0x10   :  { %2583 = vmatprep.subr.bf16.mxu1 %v2582_v43  ;;  %v85_v1 = vld [vmem:[%s4007_s4 + $0x50] sm:$0xff]  ;;  %v86_v2 = vld [vmem:[%s4007_s4 + $0x58] sm:$0xff]  ;;  %v2590_v4 = vpack.c.bf16 %v134_v61, %v133_v60  ;;  %v104_v7 = vld [vmem:[%s4007_s4 + $0xe8] sm:$0xff] }
  0x11   :  { %v117_v3 = vld [vmem:[%s4007_s4 + $0x150] sm:$0xff]  ;;  %v118_v5 = vld [vmem:[%s4007_s4 + $0x158] sm:$0xff]  ;;  %v135_v8 = vld [vmem:[%s4007_s4 + $0x1e0] sm:$0xff]  ;;  %v2560_v10 = vpack.c.bf16 %v86_v2, %v85_v1  ;;  %v2562_v14 = vpack.c.bf16 %v104_v7, %v103_v6 }
  0x12   :  { %2553 = vmatpush3.bf16.msra.mxu0 %v2552_v50  ;;  %v136_v9 = vld [vmem:[%s4007_s4 + $0x1e8] sm:$0xff]  ;;  %v87_v11 = vld [vmem:[%s4007_s4 + $0x60] sm:$0xff]  ;;  %v2592_v13 = vpack.c.bf16 %v118_v5, %v117_v3  ;;  %v46_v17 = vld [vmem:[%s4008_s1 + $0x18] sm:$0xff] }
  0x13   :  { %2585 = vmatpush3.bf16.msra.mxu1 %v2584_v51  ;;  %2555 = vmatprep.subr.bf16.mxu0 %v2554_v52  ;;  %v88_v12 = vld [vmem:[%s4007_s4 + $0x68] sm:$0xff]  ;;  %v119_v15 = vld [vmem:[%s4007_s4 + $0x160] sm:$0xff]  ;;  %v2594_v18 = vpack.c.bf16 %v136_v9, %v135_v8  ;;  %v105_v20 = vld [vmem:[%s4007_s4 + $0xf0] sm:$0xff] }
  0x14   :  { %2587 = vmatprep.subr.bf16.mxu1 %v2586_v56  ;;  %v44_v16 = vld [vmem:[%s4008_s1 + $0x8] sm:$0xff]  ;;  %v106_v21 = vld [vmem:[%s4007_s4 + $0xf8] sm:$0xff]  ;;  %v137_v22 = vld [vmem:[%s4007_s4 + $0x1f0] sm:$0xff]  ;;  %470 = vmatprep.mubr.f32.mxu1 %v46_v17  ;;  %v2564_v24 = vpack.c.bf16 %v88_v12, %v87_v11 }
  0x15   :  { %v120_v19 = vld [vmem:[%s4007_s4 + $0x168] sm:$0xff]  ;;  %395 = vmatprep.mubr.f32.mxu0 %v44_v16  ;;  %v138_v23 = vld [vmem:[%s4007_s4 + $0x1f8] sm:$0xff]  ;;  %v2566_v26 = vpack.c.bf16 %v106_v21, %v105_v20  ;;  %v89_v27 = vld [vmem:[%s4007_s4 + $0x70] sm:$0xff] }
  0x16   :  { %2557 = vmatpush3.bf16.msra.mxu0 %v2556_v62  ;;  %v2596_v25 = vpack.c.bf16 %v120_v19, %v119_v15  ;;  %v90_v28 = vld [vmem:[%s4007_s4 + $0x78] sm:$0xff]  ;;  %v121_v29 = vld [vmem:[%s4007_s4 + $0x170] sm:$0xff]  ;;  %v2598_v30 = vpack.c.bf16 %v138_v23, %v137_v22  ;;  %v155_v32 = vld [vmem:[%s4007_s4 + $0x280] sm:$0xff] }
  0x17   :  { %2589 = vmatpush3.bf16.msra.mxu1 %v2588_v63  ;;  %2559 = vmatprep.subr.bf16.mxu0 %v2558_v0  ;;  %v122_v31 = vld [vmem:[%s4007_s4 + $0x178] sm:$0xff]  ;;  %v156_v33 = vld [vmem:[%s4007_s4 + $0x288] sm:$0xff]  ;;  %v187_v34 = vld [vmem:[%s4007_s4 + $0x380] sm:$0xff]  ;;  %v2568_v36 = vpack.c.bf16 %v90_v28, %v89_v27 }
  0x18   :  { %2591 = vmatprep.subr.bf16.mxu1 %v2590_v4  ;;  %v188_v35 = vld [vmem:[%s4007_s4 + $0x388] sm:$0xff]  ;;  %v2600_v37 = vpack.c.bf16 %v122_v31, %v121_v29  ;;  %v2602_v38 = vpack.c.bf16 %v156_v33, %v155_v32  ;;  %v139_v39 = vld [vmem:[%s4007_s4 + $0x200] sm:$0xff]  ;;  %v157_v44 = vld [vmem:[%s4007_s4 + $0x290] sm:$0xff] }
  0x19   :  { %v140_v40 = vld [vmem:[%s4007_s4 + $0x208] sm:$0xff]  ;;  %v171_v41 = vld [vmem:[%s4007_s4 + $0x300] sm:$0xff]  ;;  %v2634_v42 = vpack.c.bf16 %v188_v35, %v187_v34  ;;  %v158_v45 = vld [vmem:[%s4007_s4 + $0x298] sm:$0xff] }
  0x1a   :  { %2561 = vmatpush3.bf16.msra.mxu0 %v2560_v10  ;;  %v172_v43 = vld [vmem:[%s4007_s4 + $0x308] sm:$0xff]  ;;  %v189_v46 = vld [vmem:[%s4007_s4 + $0x390] sm:$0xff]  ;;  %v190_v47 = vld [vmem:[%s4007_s4 + $0x398] sm:$0xff]  ;;  %v2604_v50 = vpack.c.bf16 %v140_v40, %v139_v39  ;;  %v2606_v52 = vpack.c.bf16 %v158_v45, %v157_v44 }
  0x1b   :  { %2593 = vmatpush3.bf16.msra.mxu1 %v2592_v13  ;;  %2563 = vmatprep.subr.bf16.mxu0 %v2562_v14  ;;  %v43_v48 = vld [vmem:[%s4008_s1] sm:$0xff]  ;;  %v45_v49 = vld [vmem:[%s4008_s1 + $0x10] sm:$0xff]  ;;  %v2636_v51 = vpack.c.bf16 %v172_v43, %v171_v41  ;;  %v142_v54 = vld [vmem:[%s4007_s4 + $0x218] sm:$0xff]  ;;  %v2638_v56 = vpack.c.bf16 %v190_v47, %v189_v46 }
  0x1c   :  { %2595 = vmatprep.subr.bf16.mxu1 %v2594_v18  ;;  %v141_v53 = vld [vmem:[%s4007_s4 + $0x210] sm:$0xff]  ;;  %v174_v57 = vld [vmem:[%s4007_s4 + $0x318] sm:$0xff]  ;;  %v159_v58 = vld [vmem:[%s4007_s4 + $0x2a0] sm:$0xff] }
  0x1d   :  { %v173_v55 = vld [vmem:[%s4007_s4 + $0x310] sm:$0xff]  ;;  %v160_v59 = vld [vmem:[%s4007_s4 + $0x2a8] sm:$0xff]  ;;  %v191_v60 = vld [vmem:[%s4007_s4 + $0x3a0] sm:$0xff]  ;;  %v2608_v62 = vpack.c.bf16 %v142_v54, %v141_v53 }
  0x1e   :  { %2565 = vmatpush3.bf16.msra.mxu0 %v2564_v24  ;;  %v192_v61 = vld [vmem:[%s4007_s4 + $0x3a8] sm:$0xff]  ;;  %v2640_v63 = vpack.c.bf16 %v174_v57, %v173_v55  ;;  %v2610_v0 = vpack.c.bf16 %v160_v59, %v159_v58  ;;  %v143_v1 = vld [vmem:[%s4007_s4 + $0x220] sm:$0xff]  ;;  %v161_v6 = vld [vmem:[%s4007_s4 + $0x2b0] sm:$0xff] }
  0x1f   :  { %2597 = vmatpush3.bf16.msra.mxu1 %v2596_v25  ;;  %2567 = vmatprep.subr.bf16.mxu0 %v2566_v26  ;;  %v144_v2 = vld [vmem:[%s4007_s4 + $0x228] sm:$0xff]  ;;  %v175_v3 = vld [vmem:[%s4007_s4 + $0x320] sm:$0xff]  ;;  %v2642_v4 = vpack.c.bf16 %v192_v61, %v191_v60  ;;  %v162_v7 = vld [vmem:[%s4007_s4 + $0x2b8] sm:$0xff] }
  0x20   :  { %2599 = vmatprep.subr.bf16.mxu1 %v2598_v30  ;;  %v176_v5 = vld [vmem:[%s4007_s4 + $0x328] sm:$0xff]  ;;  %v145_v8 = vld [vmem:[%s4007_s4 + $0x230] sm:$0xff]  ;;  %v194_v10 = vld [vmem:[%s4007_s4 + $0x3b8] sm:$0xff]  ;;  %v2612_v11 = vpack.c.bf16 %v144_v2, %v143_v1  ;;  %v2614_v16 = vpack.c.bf16 %v162_v7, %v161_v6 }
  0x21   :  { %v193_v9 = vld [vmem:[%s4007_s4 + $0x3b0] sm:$0xff]  ;;  %v146_v12 = vld [vmem:[%s4007_s4 + $0x238] sm:$0xff]  ;;  %v2644_v15 = vpack.c.bf16 %v176_v5, %v175_v3  ;;  %v163_v17 = vld [vmem:[%s4007_s4 + $0x2c0] sm:$0xff] }
  0x22   :  { %2569 = vmatpush3.bf16.msra.mxu0 %v2568_v36  ;;  %v177_v13 = vld [vmem:[%s4007_s4 + $0x330] sm:$0xff]  ;;  %v178_v14 = vld [vmem:[%s4007_s4 + $0x338] sm:$0xff]  ;;  %v60_v18 = vld [vmem:[%s4008_s1 + $0x88] sm:$0xff]  ;;  %v2646_v20 = vpack.c.bf16 %v194_v10, %v193_v9  ;;  %v2616_v26 = vpack.c.bf16 %v146_v12, %v145_v8 }
  0x23   :  { %2601 = vmatpush3.bf16.msra.mxu1 %v2600_v37  ;;  %2603 = vmatprep.subr.bf16.mxu0 %v2602_v38  ;;  %v62_v19 = vld [vmem:[%s4008_s1 + $0x98] sm:$0xff]  ;;  %v164_v21 = vld [vmem:[%s4007_s4 + $0x2c8] sm:$0xff]  ;;  %v59_v22 = vld [vmem:[%s4008_s1 + $0x80] sm:$0xff]  ;;  %v2648_v29 = vpack.c.bf16 %v178_v14, %v177_v13 }
  0x24   :  { %2635 = vmatprep.subr.bf16.mxu1 %v2634_v42  ;;  %v61_v23 = vld [vmem:[%s4008_s1 + $0x90] sm:$0xff]  ;;  %v195_v24 = vld [vmem:[%s4007_s4 + $0x3c0] sm:$0xff]  ;;  %v196_v25 = vld [vmem:[%s4007_s4 + $0x3c8] sm:$0xff]  ;;  %v2618_v30 = vpack.c.bf16 %v164_v21, %v163_v17 }
  0x25   :  { %396 = vmatmul.mubr.f32.vlgmr.msra.gmra.mrb[0].mxu0 %v43_v48  ;;  %v147_v27 = vld [vmem:[%s4007_s4 + $0x240] sm:$0xff]  ;;  %v148_v28 = vld [vmem:[%s4007_s4 + $0x248] sm:$0xff]  ;;  %v2650_v34 = vpack.c.bf16 %v196_v25, %v195_v24  ;;  %v165_v35 = vld [vmem:[%s4007_s4 + $0x2d0] sm:$0xff] }
  0x26   :  { %471 = vmatmul.mubr.f32.vlgmr.msra.gmra.mrb[0].mxu1 %v45_v49  ;;  %2605 = vmatpush3.bf16.msra.mxu0 %v2604_v50  ;;  %v179_v31 = vld [vmem:[%s4007_s4 + $0x340] sm:$0xff]  ;;  %v180_v32 = vld [vmem:[%s4007_s4 + $0x348] sm:$0xff]  ;;  %v166_v36 = vld [vmem:[%s4007_s4 + $0x2d8] sm:$0xff]  ;;  %v2620_v40 = vpack.c.bf16 %v148_v28, %v147_v27 }
  0x27   :  { %2637 = vmatpush3.bf16.msra.mxu1 %v2636_v51  ;;  %2607 = vmatprep.subr.bf16.mxu0 %v2606_v52  ;;  %v48_v33 = vld [vmem:[%s4008_s1 + $0x28] sm:$0xff]  ;;  %v50_v37 = vld [vmem:[%s4008_s1 + $0x38] sm:$0xff]  ;;  %v197_v38 = vld [vmem:[%s4007_s4 + $0x3d0] sm:$0xff]  ;;  %v2652_v41 = vpack.c.bf16 %v180_v32, %v179_v31  ;;  %v2622_v42 = vpack.c.bf16 %v166_v36, %v165_v35 }
  0x28   :  { %2639 = vmatprep.subr.bf16.mxu1 %v2638_v56  ;;  %400 = vmatprep.mubr.f32.mxu0 %v60_v18  ;;  %v198_v39 = vld [vmem:[%s4007_s4 + $0x3d8] sm:$0xff]  ;;  %v149_v43 = vld [vmem:[%s4007_s4 + $0x250] sm:$0xff]  ;;  %v167_v48 = vld [vmem:[%s4007_s4 + $0x2e0] sm:$0xff] }
  0x29   :  { %475 = vmatprep.mubr.f32.mxu1 %v62_v19  ;;  %401 = vmatmul.mubr.f32.gmra.mrb[2].mxu0 %v59_v22  ;;  %v150_v44 = vld [vmem:[%s4007_s4 + $0x258] sm:$0xff]  ;;  %v181_v45 = vld [vmem:[%s4007_s4 + $0x350] sm:$0xff]  ;;  %v2654_v46 = vpack.c.bf16 %v198_v39, %v197_v38  ;;  %v168_v49 = vld [vmem:[%s4007_s4 + $0x2e8] sm:$0xff] }
  0x2a   :  { %2609 = vmatpush3.bf16.msra.mxu0 %v2608_v62  ;;  %476 = vmatmul.mubr.f32.gmra.mrb[2].mxu1 %v61_v23  ;;  %v182_v47 = vld [vmem:[%s4007_s4 + $0x358] sm:$0xff]  ;;  %v199_v50 = vld [vmem:[%s4007_s4 + $0x3e0] sm:$0xff]  ;;  %v200_v51 = vld [vmem:[%s4007_s4 + $0x3e8] sm:$0xff]  ;;  %v2624_v52 = vpack.c.bf16 %v150_v44, %v149_v43  ;;  %v2626_v54 = vpack.c.bf16 %v168_v49, %v167_v48 }
  0x2b   :  { %2641 = vmatpush3.bf16.msra.mxu1 %v2640_v63  ;;  %2611 = vmatprep.subr.bf16.mxu0 %v2610_v0  ;;  %v2656_v53 = vpack.c.bf16 %v182_v47, %v181_v45  ;;  %v151_v55 = vld [vmem:[%s4007_s4 + $0x260] sm:$0xff]  ;;  %v152_v56 = vld [vmem:[%s4007_s4 + $0x268] sm:$0xff]  ;;  %v2658_v58 = vpack.c.bf16 %v200_v51, %v199_v50  ;;  %v169_v60 = vld [vmem:[%s4007_s4 + $0x2f0] sm:$0xff] }
  0x2c   :  { %2643 = vmatprep.subr.bf16.mxu1 %v2642_v4  ;;  %545 = vmatprep.mubr.f32.mxu0 %v48_v33  ;;  %v183_v57 = vld [vmem:[%s4007_s4 + $0x360] sm:$0xff]  ;;  %v184_v59 = vld [vmem:[%s4007_s4 + $0x368] sm:$0xff]  ;;  %v170_v61 = vld [vmem:[%s4007_s4 + $0x2f8] sm:$0xff]  ;;  %v2628_v0 = vpack.c.bf16 %v152_v56, %v151_v55 }
  0x2d   :  { %620 = vmatprep.mubr.f32.mxu1 %v50_v37  ;;  %v201_v62 = vld [vmem:[%s4007_s4 + $0x3f0] sm:$0xff]  ;;  %v202_v63 = vld [vmem:[%s4007_s4 + $0x3f8] sm:$0xff]  ;;  %v2660_v1 = vpack.c.bf16 %v184_v59, %v183_v57  ;;  %v2630_v2 = vpack.c.bf16 %v170_v61, %v169_v60  ;;  %v219_v8 = vld [vmem:[%s4007_s4 + $0x480] sm:$0xff] }
  0x2e   :  { %2613 = vmatpush3.bf16.msra.mxu0 %v2612_v11  ;;  %v153_v3 = vld [vmem:[%s4007_s4 + $0x270] sm:$0xff]  ;;  %v154_v4 = vld [vmem:[%s4007_s4 + $0x278] sm:$0xff]  ;;  %v2662_v6 = vpack.c.bf16 %v202_v63, %v201_v62  ;;  %v220_v9 = vld [vmem:[%s4007_s4 + $0x488] sm:$0xff] }
  0x2f   :  { %2645 = vmatpush3.bf16.msra.mxu1 %v2644_v15  ;;  %2615 = vmatprep.subr.bf16.mxu0 %v2614_v16  ;;  %v185_v5 = vld [vmem:[%s4007_s4 + $0x370] sm:$0xff]  ;;  %v186_v7 = vld [vmem:[%s4007_s4 + $0x378] sm:$0xff]  ;;  %v251_v10 = vld [vmem:[%s4007_s4 + $0x580] sm:$0xff]  ;;  %v2632_v12 = vpack.c.bf16 %v154_v4, %v153_v3  ;;  %v2666_v14 = vpack.c.bf16 %v220_v9, %v219_v8 }
  0x30   :  { %2647 = vmatprep.subr.bf16.mxu1 %v2646_v20  ;;  %v252_v11 = vld [vmem:[%s4007_s4 + $0x588] sm:$0xff]  ;;  %v2664_v13 = vpack.c.bf16 %v186_v7, %v185_v5  ;;  %v203_v15 = vld [vmem:[%s4007_s4 + $0x400] sm:$0xff]  ;;  %v49_v21 = vld [vmem:[%s4008_s1 + $0x30] sm:$0xff] }
  0x31   :  { %v204_v16 = vld [vmem:[%s4007_s4 + $0x408] sm:$0xff]  ;;  %v47_v17 = vld [vmem:[%s4008_s1 + $0x20] sm:$0xff]  ;;  %v2698_v18 = vpack.c.bf16 %v252_v11, %v251_v10  ;;  %v221_v22 = vld [vmem:[%s4007_s4 + $0x490] sm:$0xff] }
  0x32   :  { %2617 = vmatpush3.bf16.msra.mxu0 %v2616_v26  ;;  %v235_v19 = vld [vmem:[%s4007_s4 + $0x500] sm:$0xff]  ;;  %v236_v20 = vld [vmem:[%s4007_s4 + $0x508] sm:$0xff]  ;;  %v222_v23 = vld [vmem:[%s4007_s4 + $0x498] sm:$0xff]  ;;  %v2668_v24 = vpack.c.bf16 %v204_v16, %v203_v15 }
  0x33   :  { %2649 = vmatpush3.bf16.msra.mxu1 %v2648_v29  ;;  %2619 = vmatprep.subr.bf16.mxu0 %v2618_v30  ;;  %v64_v25 = vld [vmem:[%s4008_s1 + $0xa8] sm:$0xff]  ;;  %v253_v26 = vld [vmem:[%s4007_s4 + $0x590] sm:$0xff]  ;;  %v254_v27 = vld [vmem:[%s4007_s4 + $0x598] sm:$0xff]  ;;  %v2700_v28 = vpack.c.bf16 %v236_v20, %v235_v19  ;;  %v2670_v32 = vpack.c.bf16 %v222_v23, %v221_v22 }
  0x34   :  { %2651 = vmatprep.subr.bf16.mxu1 %v2650_v34  ;;  %v205_v29 = vld [vmem:[%s4007_s4 + $0x410] sm:$0xff]  ;;  %v206_v30 = vld [vmem:[%s4007_s4 + $0x418] sm:$0xff]  ;;  %v223_v34 = vld [vmem:[%s4007_s4 + $0x4a0] sm:$0xff]  ;;  %v2702_v37 = vpack.c.bf16 %v254_v27, %v253_v26 }
  0x35   :  { %v237_v31 = vld [vmem:[%s4007_s4 + $0x510] sm:$0xff]  ;;  %v238_v33 = vld [vmem:[%s4007_s4 + $0x518] sm:$0xff]  ;;  %v224_v35 = vld [vmem:[%s4007_s4 + $0x4a8] sm:$0xff] }
  0x36   :  { %2621 = vmatpush3.bf16.msra.mxu0 %v2620_v40  ;;  %v66_v36 = vld [vmem:[%s4008_s1 + $0xb8] sm:$0xff]  ;;  %v255_v38 = vld [vmem:[%s4007_s4 + $0x5a0] sm:$0xff]  ;;  %v256_v39 = vld [vmem:[%s4007_s4 + $0x5a8] sm:$0xff]  ;;  %v2704_v43 = vpack.c.bf16 %v238_v33, %v237_v31  ;;  %v2674_v44 = vpack.c.bf16 %v224_v35, %v223_v34 }
  0x37   :  { %2653 = vmatpush3.bf16.msra.mxu1 %v2652_v41  ;;  %2623 = vmatprep.subr.bf16.mxu0 %v2622_v42  ;;  %v63_v40 = vld [vmem:[%s4008_s1 + $0xa0] sm:$0xff]  ;;  %v2672_v41 = vpack.c.bf16 %v206_v30, %v205_v29  ;;  %v65_v42 = vld [vmem:[%s4008_s1 + $0xb0] sm:$0xff]  ;;  %v2706_v48 = vpack.c.bf16 %v256_v39, %v255_v38  ;;  %v240_v49 = vld [vmem:[%s4007_s4 + $0x528] sm:$0xff] }
  0x38   :  { %2655 = vmatprep.subr.bf16.mxu1 %v2654_v46  ;;  %v207_v45 = vld [vmem:[%s4007_s4 + $0x420] sm:$0xff]  ;;  %v208_v46 = vld [vmem:[%s4007_s4 + $0x428] sm:$0xff]  ;;  %v225_v50 = vld [vmem:[%s4007_s4 + $0x4b0] sm:$0xff] }
  0x39   :  { %v239_v47 = vld [vmem:[%s4007_s4 + $0x520] sm:$0xff]  ;;  %v226_v51 = vld [vmem:[%s4007_s4 + $0x4b8] sm:$0xff]  ;;  %v2676_v55 = vpack.c.bf16 %v208_v46, %v207_v45  ;;  %v209_v59 = vld [vmem:[%s4007_s4 + $0x430] sm:$0xff] }
  0x3a   :  { %2625 = vmatpush3.bf16.msra.mxu0 %v2624_v52  ;;  %v257_v52 = vld [vmem:[%s4007_s4 + $0x5b0] sm:$0xff]  ;;  %v54_v56 = vld [vmem:[%s4008_s1 + $0x58] sm:$0xff]  ;;  %v2708_v57 = vpack.c.bf16 %v240_v49, %v239_v47  ;;  %v260_v3 = vld [vmem:[%s4007_s4 + $0x5c8] sm:$0xff] }
  0x3b   :  { %2657 = vmatpush3.bf16.msra.mxu1 %v2656_v53  ;;  %2627 = vmatprep.subr.bf16.mxu0 %v2626_v54  ;;  %v258_v53 = vld [vmem:[%s4007_s4 + $0x5b8] sm:$0xff]  ;;  %v52_v54 = vld [vmem:[%s4008_s1 + $0x48] sm:$0xff]  ;;  %v241_v61 = vld [vmem:[%s4007_s4 + $0x530] sm:$0xff] }
  0x3c   :  { %2659 = vmatprep.subr.bf16.mxu1 %v2658_v58  ;;  %v2678_v58 = vpack.c.bf16 %v226_v51, %v225_v50  ;;  %v210_v60 = vld [vmem:[%s4007_s4 + $0x438] sm:$0xff]  ;;  %v2710_v62 = vpack.c.bf16 %v258_v53, %v257_v52  ;;  %v211_v7 = vld [vmem:[%s4007_s4 + $0x440] sm:$0xff]  ;;  %v212_v8 = vld [vmem:[%s4007_s4 + $0x448] sm:$0xff] }
  0x3d   :  { %v242_v63 = vld [vmem:[%s4007_s4 + $0x538] sm:$0xff]  ;;  %v2680_v4 = vpack.c.bf16 %v210_v60, %v209_v59  ;;  %v243_v9 = vld [vmem:[%s4007_s4 + $0x540] sm:$0xff]  ;;  %v244_v11 = vld [vmem:[%s4007_s4 + $0x548] sm:$0xff]  ;;  %v2684_v16 = vpack.c.bf16 %v212_v8, %v211_v7 }
  0x3e   :  { %2629 = vmatpush3.bf16.msra.mxu0 %v2628_v0  ;;  %v227_v0 = vld [vmem:[%s4007_s4 + $0x4c0] sm:$0xff]  ;;  %v2712_v5 = vpack.c.bf16 %v242_v63, %v241_v61  ;;  %v262_v15 = vld [vmem:[%s4007_s4 + $0x5d8] sm:$0xff]  ;;  %v213_v19 = vld [vmem:[%s4007_s4 + $0x450] sm:$0xff] }
  0x3f   :  { %2661 = vmatpush3.bf16.msra.mxu1 %v2660_v1  ;;  %2631 = vmatprep.subr.bf16.mxu0 %v2630_v2  ;;  %v228_v1 = vld [vmem:[%s4007_s4 + $0x4c8] sm:$0xff]  ;;  %v259_v2 = vld [vmem:[%s4007_s4 + $0x5c0] sm:$0xff]  ;;  %v214_v20 = vld [vmem:[%s4007_s4 + $0x458] sm:$0xff] }
  0x40   :  { %2663 = vmatprep.subr.bf16.mxu1 %v2662_v6  ;;  %v2682_v6 = vpack.c.bf16 %v228_v1, %v227_v0  ;;  %v2714_v10 = vpack.c.bf16 %v260_v3, %v259_v2  ;;  %v246_v23 = vld [vmem:[%s4007_s4 + $0x558] sm:$0xff]  ;;  %v263_v26 = vld [vmem:[%s4007_s4 + $0x5e0] sm:$0xff]  ;;  %v264_v27 = vld [vmem:[%s4007_s4 + $0x5e8] sm:$0xff] }
  0x41   :  { %v215_v31 = vld [vmem:[%s4007_s4 + $0x460] sm:$0xff]  ;;  %v2722_v34 = vpack.c.bf16 %v264_v27, %v263_v26  ;;  %v248_v35 = vld [vmem:[%s4007_s4 + $0x568] sm:$0xff]  ;;  %v265_v38 = vld [vmem:[%s4007_s4 + $0x5f0] sm:$0xff] }
  0x42   :  { %2633 = vmatpush3.bf16.msra.mxu0 %v2632_v12  ;;  %v229_v12 = vld [vmem:[%s4007_s4 + $0x4d0] sm:$0xff]  ;;  %v247_v33 = vld [vmem:[%s4007_s4 + $0x560] sm:$0xff]  ;;  %v266_v39 = vld [vmem:[%s4007_s4 + $0x5f8] sm:$0xff] }
  0x43   :  { %2665 = vmatpush3.bf16.msra.mxu1 %v2664_v13  ;;  %2667 = vmatprep.subr.bf16.mxu0 %v2666_v14  ;;  %v230_v13 = vld [vmem:[%s4007_s4 + $0x4d8] sm:$0xff]  ;;  %v261_v14 = vld [vmem:[%s4007_s4 + $0x5d0] sm:$0xff]  ;;  %v2726_v46 = vpack.c.bf16 %v266_v39, %v265_v38  ;;  %v284_v49 = vld [vmem:[%s4007_s4 + $0x688] sm:$0xff] }
  0x44   :  { %2699 = vmatprep.subr.bf16.mxu1 %v2698_v18  ;;  %v2686_v18 = vpack.c.bf16 %v230_v13, %v229_v12  ;;  %v2718_v22 = vpack.c.bf16 %v262_v15, %v261_v14  ;;  %v249_v45 = vld [vmem:[%s4007_s4 + $0x570] sm:$0xff]  ;;  %v250_v47 = vld [vmem:[%s4007_s4 + $0x578] sm:$0xff]  ;;  %v315_v50 = vld [vmem:[%s4007_s4 + $0x780] sm:$0xff] }
  0x45   :  { %546 = vmatmul.mubr.f32.vlgmr.msra.gmra.mrb[4].mxu0 %v47_v17  ;;  %v2716_v17 = vpack.c.bf16 %v244_v11, %v243_v9  ;;  %v316_v51 = vld [vmem:[%s4007_s4 + $0x788] sm:$0xff]  ;;  %v2728_v53 = vpack.c.bf16 %v250_v47, %v249_v45  ;;  %v299_v59 = vld [vmem:[%s4007_s4 + $0x700] sm:$0xff]  ;;  %v53_v61 = vld [vmem:[%s4008_s1 + $0x50] sm:$0xff] }
  0x46   :  { %2669 = vmatpush3.bf16.msra.mxu0 %v2668_v24  ;;  %621 = vmatmul.mubr.f32.vlgmr.msra.gmra.mrb[4].mxu1 %v49_v21  ;;  %v245_v21 = vld [vmem:[%s4007_s4 + $0x550] sm:$0xff]  ;;  %v231_v24 = vld [vmem:[%s4007_s4 + $0x4e0] sm:$0xff]  ;;  %v300_v60 = vld [vmem:[%s4007_s4 + $0x708] sm:$0xff] }
  0x47   :  { %2701 = vmatpush3.bf16.msra.mxu1 %v2700_v28  ;;  %550 = vmatprep.mubr.f32.mxu0 %v64_v25  ;;  %v232_v25 = vld [vmem:[%s4007_s4 + $0x4e8] sm:$0xff]  ;;  %v2688_v28 = vpack.c.bf16 %v214_v20, %v213_v19  ;;  %v2720_v29 = vpack.c.bf16 %v246_v23, %v245_v21  ;;  %v286_v63 = vld [vmem:[%s4007_s4 + $0x698] sm:$0xff]  ;;  %v317_v2 = vld [vmem:[%s4007_s4 + $0x790] sm:$0xff] }
  0x48   :  { %2671 = vmatprep.subr.bf16.mxu0 %v2670_v32  ;;  %625 = vmatprep.mubr.f32.mxu1 %v66_v36  ;;  %v2690_v30 = vpack.c.bf16 %v232_v25, %v231_v24  ;;  %v216_v32 = vld [vmem:[%s4007_s4 + $0x468] sm:$0xff]  ;;  %v233_v36 = vld [vmem:[%s4007_s4 + $0x4f0] sm:$0xff]  ;;  %v318_v3 = vld [vmem:[%s4007_s4 + $0x798] sm:$0xff] }
  0x49   :  { %551 = vmatmul.mubr.f32.gmra.mrb[6].mxu0 %v63_v40  ;;  %2703 = vmatprep.subr.bf16.mxu1 %v2702_v37  ;;  %v234_v37 = vld [vmem:[%s4007_s4 + $0x4f8] sm:$0xff]  ;;  %v2692_v40 = vpack.c.bf16 %v216_v32, %v215_v31  ;;  %v68_v1 = vld [vmem:[%s4008_s1 + $0xc8] sm:$0xff]  ;;  %v301_v7 = vld [vmem:[%s4007_s4 + $0x710] sm:$0xff]  ;;  %v2766_v13 = vpack.c.bf16 %v318_v3, %v317_v2 }
  0x4a   :  { %2673 = vmatpush3.bf16.msra.mxu0 %v2672_v41  ;;  %626 = vmatmul.mubr.f32.gmra.mrb[6].mxu1 %v65_v42  ;;  %v2724_v41 = vpack.c.bf16 %v248_v35, %v247_v33  ;;  %v2694_v42 = vpack.c.bf16 %v234_v37, %v233_v36  ;;  %v302_v9 = vld [vmem:[%s4007_s4 + $0x718] sm:$0xff]  ;;  %v288_v11 = vld [vmem:[%s4007_s4 + $0x6a8] sm:$0xff]  ;;  %v319_v14 = vld [vmem:[%s4007_s4 + $0x7a0] sm:$0xff] }
  0x4b   :  { %2705 = vmatpush3.bf16.msra.mxu1 %v2704_v43  ;;  %2675 = vmatprep.subr.bf16.mxu0 %v2674_v44  ;;  %v217_v43 = vld [vmem:[%s4007_s4 + $0x470] sm:$0xff]  ;;  %v218_v44 = vld [vmem:[%s4007_s4 + $0x478] sm:$0xff]  ;;  %v320_v15 = vld [vmem:[%s4007_s4 + $0x7a8] sm:$0xff]  ;;  %v2768_v19 = vpack.c.bf16 %v302_v9, %v301_v7 }
  0x4c   :  { %2707 = vmatprep.subr.bf16.mxu1 %v2706_v48  ;;  %695 = vmatprep.mubr.f32.mxu0 %v52_v54  ;;  %v283_v48 = vld [vmem:[%s4007_s4 + $0x680] sm:$0xff]  ;;  %v2696_v52 = vpack.c.bf16 %v218_v44, %v217_v43  ;;  %v70_v12 = vld [vmem:[%s4008_s1 + $0xd8] sm:$0xff]  ;;  %v2770_v24 = vpack.c.bf16 %v320_v15, %v319_v14  ;;  %v304_v25 = vld [vmem:[%s4007_s4 + $0x728] sm:$0xff] }
  0x4d   :  { %770 = vmatprep.mubr.f32.mxu1 %v54_v56  ;;  %v2730_v54 = vpack.c.bf16 %v284_v49, %v283_v48  ;;  %v268_v56 = vld [vmem:[%s4007_s4 + $0x608] sm:$0xff]  ;;  %v271_v21 = vld [vmem:[%s4007_s4 + $0x620] sm:$0xff]  ;;  %v289_v26 = vld [vmem:[%s4007_s4 + $0x6b0] sm:$0xff] }
  0x4e   :  { %2677 = vmatpush3.bf16.msra.mxu0 %v2676_v55  ;;  %v267_v55 = vld [vmem:[%s4007_s4 + $0x600] sm:$0xff]  ;;  %v290_v27 = vld [vmem:[%s4007_s4 + $0x6b8] sm:$0xff]  ;;  %v273_v35 = vld [vmem:[%s4007_s4 + $0x630] sm:$0xff] }
  0x4f   :  { %2709 = vmatpush3.bf16.msra.mxu1 %v2708_v57  ;;  %2679 = vmatprep.subr.bf16.mxu0 %v2678_v58  ;;  %v51_v57 = vld [vmem:[%s4008_s1 + $0x40] sm:$0xff]  ;;  %v2762_v58 = vpack.c.bf16 %v316_v51, %v315_v50  ;;  %v2732_v0 = vpack.c.bf16 %v268_v56, %v267_v55  ;;  %v58_v32 = vld [vmem:[%s4008_s1 + $0x78] sm:$0xff]  ;;  %v305_v37 = vld [vmem:[%s4007_s4 + $0x730] sm:$0xff] }
  0x50   :  { %2711 = vmatprep.subr.bf16.mxu1 %v2710_v62  ;;  %v285_v62 = vld [vmem:[%s4007_s4 + $0x690] sm:$0xff]  ;;  %v303_v23 = vld [vmem:[%s4007_s4 + $0x720] sm:$0xff]  ;;  %v274_v36 = vld [vmem:[%s4007_s4 + $0x638] sm:$0xff] }
  0x51   :  { %v2734_v8 = vpack.c.bf16 %v286_v63, %v285_v62  ;;  %v2772_v33 = vpack.c.bf16 %v304_v25, %v303_v23  ;;  %v306_v39 = vld [vmem:[%s4007_s4 + $0x738] sm:$0xff]  ;;  %v324_v43 = vld [vmem:[%s4007_s4 + $0x7c8] sm:$0xff]  ;;  %v2744_v44 = vpack.c.bf16 %v274_v36, %v273_v35  ;;  %v275_v47 = vld [vmem:[%s4007_s4 + $0x640] sm:$0xff] }
  0x52   :  { %2681 = vmatpush3.bf16.msra.mxu0 %v2680_v4  ;;  %v2764_v4 = vpack.c.bf16 %v300_v60, %v299_v59  ;;  %v2776_v45 = vpack.c.bf16 %v306_v39, %v305_v37  ;;  %v276_v48 = vld [vmem:[%s4007_s4 + $0x648] sm:$0xff]  ;;  %v307_v49 = vld [vmem:[%s4007_s4 + $0x740] sm:$0xff]  ;;  %v326_v55 = vld [vmem:[%s4007_s4 + $0x7d8] sm:$0xff] }
  0x53   :  { %2713 = vmatpush3.bf16.msra.mxu1 %v2712_v5  ;;  %2683 = vmatprep.subr.bf16.mxu0 %v2682_v6  ;;  %v269_v5 = vld [vmem:[%s4007_s4 + $0x610] sm:$0xff]  ;;  %v270_v6 = vld [vmem:[%s4007_s4 + $0x618] sm:$0xff]  ;;  %v308_v51 = vld [vmem:[%s4007_s4 + $0x748] sm:$0xff]  ;;  %v2748_v56 = vpack.c.bf16 %v276_v48, %v275_v47 }
  0x54   :  { %2715 = vmatprep.subr.bf16.mxu1 %v2714_v10  ;;  %v287_v10 = vld [vmem:[%s4007_s4 + $0x6a0] sm:$0xff]  ;;  %v277_v59 = vld [vmem:[%s4007_s4 + $0x650] sm:$0xff]  ;;  %v278_v60 = vld [vmem:[%s4007_s4 + $0x658] sm:$0xff] }
  0x55   :  { %v2738_v20 = vpack.c.bf16 %v288_v11, %v287_v10  ;;  %v310_v63 = vld [vmem:[%s4007_s4 + $0x758] sm:$0xff]  ;;  %v327_v2 = vld [vmem:[%s4007_s4 + $0x7e0] sm:$0xff]  ;;  %v328_v3 = vld [vmem:[%s4007_s4 + $0x7e8] sm:$0xff] }
  0x56   :  { %2685 = vmatpush3.bf16.msra.mxu0 %v2684_v16  ;;  %v67_v16 = vld [vmem:[%s4008_s1 + $0xc0] sm:$0xff]  ;;  %v2786_v10 = vpack.c.bf16 %v328_v3, %v327_v2  ;;  %v312_v11 = vld [vmem:[%s4007_s4 + $0x768] sm:$0xff]  ;;  %v329_v14 = vld [vmem:[%s4007_s4 + $0x7f0] sm:$0xff] }
  0x57   :  { %2717 = vmatpush3.bf16.msra.mxu1 %v2716_v17  ;;  %2687 = vmatprep.subr.bf16.mxu0 %v2686_v18  ;;  %v2736_v17 = vpack.c.bf16 %v270_v6, %v269_v5  ;;  %v69_v18 = vld [vmem:[%s4008_s1 + $0xd0] sm:$0xff]  ;;  %v279_v7 = vld [vmem:[%s4007_s4 + $0x660] sm:$0xff]  ;;  %v330_v15 = vld [vmem:[%s4007_s4 + $0x7f8] sm:$0xff] }
  0x58   :  { %2719 = vmatprep.subr.bf16.mxu1 %v2718_v22  ;;  %v272_v22 = vld [vmem:[%s4007_s4 + $0x628] sm:$0xff]  ;;  %v311_v9 = vld [vmem:[%s4007_s4 + $0x760] sm:$0xff]  ;;  %v314_v23 = vld [vmem:[%s4007_s4 + $0x778] sm:$0xff] }
  0x59   :  { %v2740_v31 = vpack.c.bf16 %v272_v22, %v271_v21  ;;  %v2790_v21 = vpack.c.bf16 %v330_v15, %v329_v14  ;;  %v313_v22 = vld [vmem:[%s4007_s4 + $0x770] sm:$0xff] }
  0x5a   :  { %2689 = vmatpush3.bf16.msra.mxu0 %v2688_v28  ;;  %v321_v28 = vld [vmem:[%s4007_s4 + $0x7b0] sm:$0xff]  ;;  %v2792_v25 = vpack.c.bf16 %v314_v23, %v313_v22 }
  0x5b   :  { %2721 = vmatpush3.bf16.msra.mxu1 %v2720_v29  ;;  %2691 = vmatprep.subr.bf16.mxu0 %v2690_v30  ;;  %v322_v29 = vld [vmem:[%s4007_s4 + $0x7b8] sm:$0xff]  ;;  %v56_v30 = vld [vmem:[%s4008_s1 + $0x68] sm:$0xff] }
  0x5c   :  { %2723 = vmatprep.subr.bf16.mxu1 %v2722_v34  ;;  %v2742_v34 = vpack.c.bf16 %v290_v27, %v289_v26  ;;  %v2774_v38 = vpack.c.bf16 %v322_v29, %v321_v28  ;;  %v55_v26 = vld [vmem:[%s4008_s1 + $0x60] sm:$0xff]  ;;  %v57_v27 = vld [vmem:[%s4008_s1 + $0x70] sm:$0xff]  ;;  %v72_v28 = vld [vmem:[%s4008_s1 + $0xe8] sm:$0xff] }
  0x5d   :  { %v74_v29 = vld [vmem:[%s4008_s1 + $0xf8] sm:$0xff] }
  0x5e   :  { %2693 = vmatpush3.bf16.msra.mxu0 %v2692_v40  ;;  %v291_v40 = vld [vmem:[%s4007_s4 + $0x6c0] sm:$0xff] }
  0x5f   :  { %2725 = vmatpush3.bf16.msra.mxu1 %v2724_v41  ;;  %2695 = vmatprep.subr.bf16.mxu0 %v2694_v42  ;;  %v292_v41 = vld [vmem:[%s4007_s4 + $0x6c8] sm:$0xff]  ;;  %v323_v42 = vld [vmem:[%s4007_s4 + $0x7c0] sm:$0xff] }
  0x60   :  { %2727 = vmatprep.subr.bf16.mxu1 %v2726_v46  ;;  %v2746_v46 = vpack.c.bf16 %v292_v41, %v291_v40  ;;  %v2778_v50 = vpack.c.bf16 %v324_v43, %v323_v42 }
  0x62   :  { %2697 = vmatpush3.bf16.msra.mxu0 %v2696_v52  ;;  %v293_v52 = vld [vmem:[%s4007_s4 + $0x6d0] sm:$0xff] }
  0x63   :  { %2729 = vmatpush3.bf16.msra.mxu1 %v2728_v53  ;;  %2731 = vmatprep.subr.bf16.mxu0 %v2730_v54  ;;  %v294_v53 = vld [vmem:[%s4007_s4 + $0x6d8] sm:$0xff]  ;;  %v325_v54 = vld [vmem:[%s4007_s4 + $0x7d0] sm:$0xff] }
  0x64   :  { %2763 = vmatprep.subr.bf16.mxu1 %v2762_v58  ;;  %v2750_v58 = vpack.c.bf16 %v294_v53, %v293_v52  ;;  %v2782_v62 = vpack.c.bf16 %v326_v55, %v325_v54 }
  0x65   :  { %696 = vmatmul.mubr.f32.vlgmr.msra.gmra.mrb[8].mxu0 %v51_v57  ;;  %v2780_v57 = vpack.c.bf16 %v308_v51, %v307_v49 }
  0x66   :  { %2733 = vmatpush3.bf16.msra.mxu0 %v2732_v0  ;;  %771 = vmatmul.mubr.f32.vlgmr.msra.gmra.mrb[8].mxu1 %v53_v61  ;;  %v309_v61 = vld [vmem:[%s4007_s4 + $0x750] sm:$0xff]  ;;  %v295_v0 = vld [vmem:[%s4007_s4 + $0x6e0] sm:$0xff] }
  0x67   :  { %2765 = vmatpush3.bf16.msra.mxu1 %v2764_v4  ;;  %700 = vmatprep.mubr.f32.mxu0 %v68_v1  ;;  %v296_v1 = vld [vmem:[%s4007_s4 + $0x6e8] sm:$0xff]  ;;  %v2752_v4 = vpack.c.bf16 %v278_v60, %v277_v59  ;;  %v2784_v5 = vpack.c.bf16 %v310_v63, %v309_v61 }
  0x68   :  { %2735 = vmatprep.subr.bf16.mxu0 %v2734_v8  ;;  %775 = vmatprep.mubr.f32.mxu1 %v70_v12  ;;  %v2754_v6 = vpack.c.bf16 %v296_v1, %v295_v0  ;;  %v280_v8 = vld [vmem:[%s4007_s4 + $0x668] sm:$0xff]  ;;  %v297_v12 = vld [vmem:[%s4007_s4 + $0x6f0] sm:$0xff] }
  0x69   :  { %701 = vmatmul.mubr.f32.gmra.mrb[10].mxu0 %v67_v16  ;;  %2767 = vmatprep.subr.bf16.mxu1 %v2766_v13  ;;  %v298_v13 = vld [vmem:[%s4007_s4 + $0x6f8] sm:$0xff]  ;;  %v2756_v16 = vpack.c.bf16 %v280_v8, %v279_v7 }
  0x6a   :  { %2737 = vmatpush3.bf16.msra.mxu0 %v2736_v17  ;;  %776 = vmatmul.mubr.f32.gmra.mrb[10].mxu1 %v69_v18  ;;  %v2788_v17 = vpack.c.bf16 %v312_v11, %v311_v9  ;;  %v2758_v18 = vpack.c.bf16 %v298_v13, %v297_v12 }
  0x6b   :  { %2769 = vmatpush3.bf16.msra.mxu1 %v2768_v19  ;;  %2739 = vmatprep.subr.bf16.mxu0 %v2738_v20  ;;  %v281_v19 = vld [vmem:[%s4007_s4 + $0x670] sm:$0xff]  ;;  %v282_v20 = vld [vmem:[%s4007_s4 + $0x678] sm:$0xff] }
  0x6c   :  { %2771 = vmatprep.subr.bf16.mxu1 %v2770_v24  ;;  %845 = vmatprep.mubr.f32.mxu0 %v56_v30  ;;  %v2760_v24 = vpack.c.bf16 %v282_v20, %v281_v19  ;;  %v71_v30 = vld [vmem:[%s4008_s1 + $0xe0] sm:$0xff] }
  0x6d   :  { %920 = vmatprep.mubr.f32.mxu1 %v58_v32 }
  0x6e   :  { %2741 = vmatpush3.bf16.msra.mxu0 %v2740_v31  ;;  %v73_v31 = vld [vmem:[%s4008_s1 + $0xf0] sm:$0xff] }
  0x6f   :  { %2773 = vmatpush3.bf16.msra.mxu1 %v2772_v33  ;;  %2743 = vmatprep.subr.bf16.mxu0 %v2742_v34 }
  0x70   :  { %2775 = vmatprep.subr.bf16.mxu1 %v2774_v38 }
  0x72   :  { %2745 = vmatpush3.bf16.msra.mxu0 %v2744_v44 }
  0x73   :  { %2777 = vmatpush3.bf16.msra.mxu1 %v2776_v45  ;;  %2747 = vmatprep.subr.bf16.mxu0 %v2746_v46 }
  0x74   :  { %2779 = vmatprep.subr.bf16.mxu1 %v2778_v50 }
  0x76   :  { %2749 = vmatpush3.bf16.msra.mxu0 %v2748_v56 }
  0x77   :  { %2781 = vmatpush3.bf16.msra.mxu1 %v2780_v57  ;;  %2751 = vmatprep.subr.bf16.mxu0 %v2750_v58 }
  0x78   :  { %2783 = vmatprep.subr.bf16.mxu1 %v2782_v62 }
  0x7a   :  { %2753 = vmatpush3.bf16.msra.mxu0 %v2752_v4 }
  0x7b   :  { %2785 = vmatpush3.bf16.msra.mxu1 %v2784_v5  ;;  %2755 = vmatprep.subr.bf16.mxu0 %v2754_v6 }
  0x7c   :  { %2787 = vmatprep.subr.bf16.mxu1 %v2786_v10 }
  0x7e   :  { %2757 = vmatpush3.bf16.msra.mxu0 %v2756_v16 }
  0x7f   :  { %2789 = vmatpush3.bf16.msra.mxu1 %v2788_v17  ;;  %2759 = vmatprep.subr.bf16.mxu0 %v2758_v18 }
  0x80   :  { %2791 = vmatprep.subr.bf16.mxu1 %v2790_v21 }
  0x82   :  { %2761 = vmatpush3.bf16.msra.mxu0 %v2760_v24 }
  0x83   :  { %2793 = vmatpush3.bf16.msra.mxu1 %v2792_v25 }
  0x85   :  { %846 = vmatmul.mubr.f32.vlgmr.msra.gmra.mrb[12].mxu0 %v55_v26 }
  0x86   :  { %921 = vmatmul.mubr.f32.vlgmr.msra.gmra.mrb[12].mxu1 %v57_v27  ;;  %850 = vmatprep.mubr.f32.mxu0 %v72_v28 }
  0x87   :  { %925 = vmatprep.mubr.f32.mxu1 %v74_v29  ;;  %v3841_v29 = vld [vmem:[%s4009_s2] sm:$0xff] }
  0x89   :  { %851 = vmatmul.mubr.f32.gmra.mrb[14].mxu0 %v71_v30 }
  0x8a   :  { %926 = vmatmul.mubr.f32.gmra.mrb[14].mxu1 %v73_v31  ;;  %2450 = vmatprep.mubr.msk.f32.mxu0 %vm939_vm0, %v3841_v29 }
  0xf8   :  { %v2122_v32 = vpop.f32.mrb[0].mxu0 }
  0xf9   :  { %v2160_v33 = vpop.f32.mrb[0].mxu1  ;;  %v2123_v34 = vpop.f32.mrb[1].mxu0 }
  0xfa   :  { %v2124_v35 = vadd.f32 %v2123_v34, %v2122_v32  ;;  %v2161_v36 = vpop.f32.mrb[1].mxu1 }
  0xfb   :  { %v2162_v37 = vadd.f32 %v2161_v36, %v2160_v33 }
  0xfc   :  { %v2125_v39 = vpop.f32.mrb[2].mxu0 }
  0xfd   :  { %v473_v38 = vadd.f32 %v2162_v37, %v2124_v35  ;;  %v2163_v40 = vpop.f32.mrb[2].mxu1  ;;  %v2126_v41 = vpop.f32.mrb[3].mxu0 }
  0xfe   :  { %v2127_v42 = vadd.f32 %v2126_v41, %v2125_v39  ;;  %v2164_v43 = vpop.f32.mrb[3].mxu1  ;;  %v3850_v39 = vld [vmem:[%s4009_s2 + $0x8] sm:$0xff]  ;;  %v3855_v41 = vld [vmem:[%s4010_s3] sm:$0xff] }
  0xff   :  { %v2165_v44 = vadd.f32 %v2164_v43, %v2163_v40  ;;  %v1120_v43 = vld [vmem:[%s4011_s5] sm:$0xff] }
 0x101   :  { %v478_v45 = vadd.f32 %v2165_v44, %v2127_v42  ;;  %v3864_v42 = vld [vmem:[%s4010_s3 + $0x8] sm:$0xff] }
 0x102   :  { %v1121_v44 = vld [vmem:[%s4011_s5 + $0x8] sm:$0xff] }
 0x118   :  { %v2198_v46 = vpop.f32.mrb[4].mxu0 }
 0x119   :  { %v2199_v47 = vpop.f32.mrb[5].mxu0  ;;  %v2236_v48 = vpop.f32.mrb[4].mxu1 }
 0x11a   :  { %v2200_v49 = vadd.f32 %v2199_v47, %v2198_v46  ;;  %v2237_v50 = vpop.f32.mrb[5].mxu1  ;;  %v1122_v46 = vld [vmem:[%s4011_s5 + $0x10] sm:$0xf]  ;;  %v1112_v47 = vlaneseq }
 0x11b   :  { %v2238_v51 = vadd.f32 %v2237_v50, %v2236_v48  ;;  %v3885_v50 = vld [vmem:[%s4012_s8] sm:$0xf] }
 0x11c   :  { %v548_v52 = vadd.f32 %v2200_v49, %v473_v38  ;;  %v2201_v53 = vpop.f32.mrb[6].mxu0  ;;  %v3879_v48 = vshrl.u32 %v1112_v47, 7 }
 0x11d   :  { %v2202_v54 = vpop.f32.mrb[7].mxu0  ;;  %v2239_v55 = vpop.f32.mrb[6].mxu1 }
 0x11e   :  { %v623_v56 = vadd.f32 %v2238_v51, %v548_v52  ;;  %v2203_v57 = vadd.f32 %v2202_v54, %v2201_v53  ;;  %v2240_v58 = vpop.f32.mrb[7].mxu1  ;;  %v1114_v49 = vsub.s32 0, %v3879_v48 }
 0x11f   :  { %v2241_v59 = vadd.f32 %v2240_v58, %v2239_v55 }
 0x120   :  { %v553_v60 = vadd.f32 %v2203_v57, %v478_v45  ;;  %v2802_v45 = vpack.c.bf16 %v1121_v44, %v1120_v43  ;;  %v1115_v51 = vrot.slane %v3885_v50, %v1114_v49  ;;  %v1658_v43 = vld [vmem:[%s4014_s7 + $0x10] sm:$0xf]  ;;  %v1646_v44 = vsub.s32 2, %v3879_v48 }
 0x122   :  { %v628_v61 = vadd.f32 %v2241_v59, %v553_v60  ;;  %2803 = vmatprep.subr.bf16.mxu1 %v2802_v45 }
 0x123   :  { %2805 = vmatpush3.bf16.msra.mxu1 %v2802_v45  ;;  %v1647_v45 = vrot.slane %v3885_v50, %v1646_v44 }
 0x124   :  { %2464 = vmatprep.subr.msk.mxu1 %vm1130_vm1, %v1122_v46 }
 0x127   :  { %2465 = vmatpush3.msk.msra.mxu1 %vm1130_vm1, %v1122_v46 }
 0x138   :  { %v2274_v62 = vpop.f32.mrb[8].mxu0 }
 0x139   :  { %v2275_v63 = vpop.f32.mrb[9].mxu0  ;;  %v2312_v0 = vpop.f32.mrb[8].mxu1 }
 0x13a   :  { %v2276_v1 = vadd.f32 %v2275_v63, %v2274_v62  ;;  %v2313_v2 = vpop.f32.mrb[9].mxu1 }
 0x13b   :  { %v2314_v3 = vadd.f32 %v2313_v2, %v2312_v0 }
 0x13c   :  { %v698_v4 = vadd.f32 %v2276_v1, %v623_v56  ;;  %v2277_v5 = vpop.f32.mrb[10].mxu0 }
 0x13d   :  { %v2278_v6 = vpop.f32.mrb[11].mxu0  ;;  %v2315_v7 = vpop.f32.mrb[10].mxu1 }
 0x13e   :  { %v773_v8 = vadd.f32 %v2314_v3, %v698_v4  ;;  %v2279_v9 = vadd.f32 %v2278_v6, %v2277_v5  ;;  %v2316_v10 = vpop.f32.mrb[11].mxu1 }
 0x13f   :  { %v2317_v11 = vadd.f32 %v2316_v10, %v2315_v7  ;;  %v1389_v7 = vld [vmem:[%s4013_s6] sm:$0xff]  ;;  %v1391_v10 = vld [vmem:[%s4013_s6 + $0x10] sm:$0xf] }
 0x140   :  { %v703_v12 = vadd.f32 %v2279_v9, %v628_v61 }
 0x142   :  { %v778_v13 = vadd.f32 %v2317_v11, %v703_v12  ;;  %v1379_v11 = vsub.s32 1, %v3879_v48 }
 0x144   :  { %v1380_v12 = vrot.slane %v3885_v50, %v1379_v11 }
 0x158   :  { %v2350_v14 = vpop.f32.mrb[12].mxu0 }
 0x159   :  { %v2351_v15 = vpop.f32.mrb[13].mxu0  ;;  %v2388_v16 = vpop.f32.mrb[12].mxu1 }
 0x15a   :  { %v2352_v17 = vadd.f32 %v2351_v15, %v2350_v14  ;;  %v2389_v18 = vpop.f32.mrb[13].mxu1 }
 0x15b   :  { %v2390_v19 = vadd.f32 %v2389_v18, %v2388_v16 }
 0x15c   :  { %v848_v20 = vadd.f32 %v2352_v17, %v773_v8  ;;  %v2353_v21 = vpop.f32.mrb[14].mxu0  ;;  %v1390_v8 = vld [vmem:[%s4013_s6 + $0x8] sm:$0xff] }
 0x15d   :  { %v2354_v22 = vpop.f32.mrb[15].mxu0  ;;  %v2391_v23 = vpop.f32.mrb[14].mxu1  ;;  %v2814_v9 = vpack.c.bf16 %v1390_v8, %v1389_v7 }
 0x15e   :  { %v923_v24 = vadd.f32 %v2390_v19, %v848_v20  ;;  %v2355_v25 = vadd.f32 %v2354_v22, %v2353_v21  ;;  %v2392_v26 = vpop.f32.mrb[15].mxu1 }
 0x15f   :  { %v2393_v27 = vadd.f32 %v2392_v26, %v2391_v23 }
 0x160   :  { %v853_v28 = vadd.f32 %v2355_v25, %v778_v13 }
 0x162   :  { %v928_v30 = vadd.f32 %v2393_v27, %v853_v28 }
 0x164   :  { %v2864_v31 = vpack.i.bf16 %v928_v30, %v923_v24 }
 0x166   :  { %2865 = vrot.lane.b32.xlu0 %v2864_v31, %s2908_s23 }
 0x16a   :  { %2870 = vrot.lane.b32.xlu0 %v2864_v31, %s2909_s24 }
 0x1d8   :  { %v2866_v32 = vpop.permute.xlu0 %2865 }
 0x1d9   :  { %v2868_v33 = vunpack.i.h.bf16 %v2866_v32  ;;  %v2867_v34 = vunpack.i.l.bf16 %v2866_v32 }
 0x1db   :  { %v2794_v35 = vpack.c.bf16 %v2868_v33, %v2867_v34 }
 0x1dc   :  { %v2871_v36 = vpop.permute.xlu0 %2870 }
 0x1dd   :  { %v2873_v37 = vunpack.i.h.bf16 %v2871_v36  ;;  %v2872_v38 = vunpack.i.l.bf16 %v2871_v36  ;;  %2795 = vmatprep.subr.bf16.mxu0 %v2794_v35 }
 0x1de   :  { %2797 = vmatpush3.bf16.msra.mxu0 %v2794_v35 }
 0x1df   :  { %v2798_v40 = vpack.c.bf16 %v2873_v37, %v2872_v38  ;;  %v1656_v37 = vld [vmem:[%s4014_s7] sm:$0xff]  ;;  %v1657_v38 = vld [vmem:[%s4014_s7 + $0x8] sm:$0xff] }
 0x1e1   :  { %2451 = vmatmul.mubr.msk.f32.vlgmr.msra.gmra.mrb[16].mxu0 %vm939_vm0, %v3850_v39  ;;  %2799 = vmatprep.subr.bf16.mxu0 %v2798_v40 }
 0x1e2   :  { %2801 = vmatpush3.bf16.msra.mxu0 %v2798_v40  ;;  %2457 = vmatprep.mubr.msk.f32.mxu0 %vm939_vm0, %v3855_v41  ;;  %v2826_v40 = vpack.c.bf16 %v1657_v38, %v1656_v37 }
 0x1e3   :  { %2815 = vmatprep.subr.bf16.mxu0 %v2814_v9 }
 0x1e9   :  { %2458 = vmatmul.mubr.msk.f32.vlgmr.msra.gmra.mrb[16].mxu0 %vm939_vm0, %v3864_v42 }
 0x1ea   :  { %2817 = vmatpush3.bf16.msra.mxu0 %v2814_v9 }
 0x1eb   :  { %2487 = vmatprep.subr.msk.mxu0 %vm1130_vm1, %v1391_v10 }
 0x1ee   :  { %2488 = vmatpush3.msk.msra.mxu0 %vm1130_vm1, %v1391_v10 }
 0x1ef   :  { %2827 = vmatprep.subr.bf16.mxu0 %v2826_v40 }
 0x2bc   :  { %v2459_v52 = vpop.f32.mrb[16].mxu0 }
 0x2bd   :  { %v2842_v53 = vadd.f32 %v2459_v52, %v928_v30  ;;  %v1101_v54 = vpop.f32.mrb[17].mxu0 }
 0x2be   :  { %v2843_v55 = vadd.f32 %v1101_v54, %v923_v24 }
 0x2bf   :  { %v1117_v56 = vadd.f32 %v2842_v53, %v1115_v51 }
 0x2c0   :  { %v1116_v57 = vadd.f32 %v2843_v55, %v1115_v51 }
 0x2c1   :  { %v3890_v59 = vmax.f32 %v1117_v56, 0.0 }
 0x2c2   :  { %v3888_v58 = vmax.f32 %v1116_v57, 0.0 }
 0x2c3   :  { %v1386_v22 = vmul.f32 0.7, %v3890_v59 }
 0x2c4   :  { %2466 = vmatprep.mubr.msk.f32.mxu1 %vm1123_vm2, %v3888_v58  ;;  %v1385_v21 = vmul.f32 0.7, %v3888_v58 }
 0x2c5   :  { %2467 = vmatmul.mubr.msk.f32.vlgmr.msra.gmra.mrb[16].mxu1 %vm1123_vm2, %v3890_v59 }
 0x2c6   :  { %2473 = vmatprep.mubr.msk.f32.mxu1 %vm939_vm0, %v3841_v29 }
 0x398   :  { %v2468_v60 = vpop.f32.mrb[16].mxu1 }
 0x399   :  { %v1200_v61 = vpop.f32.mrb[17].mxu1 }
 0x39a   :  { %v2879_v62 = vpack.i.bf16 %v2468_v60, %v1200_v61 }
 0x39c   :  { %2875 = vrot.lane.b32.xlu1 %v2879_v62, %s2908_s23 }
 0x3a0   :  { %2880 = vrot.lane.b32.xlu1 %v2879_v62, %s2909_s24  ;;  %v2910_v62 = vmov 1  }
 0x3a1   :  { %2905 = vset.pattern.permute.xlu1 %v2910_v62 }
 0x40e   :  { %v2876_v63 = vpop.permute.xlu1 %2875 }
 0x40f   :  { %v2878_v0 = vunpack.i.h.bf16 %v2876_v63  ;;  %v2877_v1 = vunpack.i.l.bf16 %v2876_v63  ;;  %v2911_v63 = vmov 0  }
 0x410   :  { %2904 = vset.pattern.permute.xlu0 %v2911_v63 }
 0x411   :  { %v2806_v2 = vpack.c.bf16 %v2878_v0, %v2877_v1 }
 0x412   :  { %v2881_v3 = vpop.permute.xlu1 %2880 }
 0x413   :  { %v2883_v4 = vunpack.i.h.bf16 %v2881_v3  ;;  %v2882_v5 = vunpack.i.l.bf16 %v2881_v3  ;;  %2807 = vmatprep.subr.bf16.mxu1 %v2806_v2  ;;  %v2085_v3 = vld [vmem:[%s4015_s0] ss:$0 sm:$0xff] }
 0x414   :  { %2809 = vmatpush3.bf16.msra.mxu1 %v2806_v2 }
 0x415   :  { %v2810_v6 = vpack.c.bf16 %v2883_v4, %v2882_v5  ;;  %v2912_v4 = vmov 2  }
 0x417   :  { %2474 = vmatmul.mubr.msk.f32.vlgmr.msra.gmra.mrb[18].mxu1 %vm939_vm0, %v3850_v39  ;;  %2811 = vmatprep.subr.bf16.mxu1 %v2810_v6 }
 0x418   :  { %2813 = vmatpush3.bf16.msra.mxu1 %v2810_v6  ;;  %2480 = vmatprep.mubr.msk.f32.mxu1 %vm939_vm0, %v3855_v41 }
 0x41f   :  { %2481 = vmatmul.mubr.msk.f32.vlgmr.msra.gmra.mrb[18].mxu1 %vm939_vm0, %v3864_v42 }
 0x420   :  { %2496 = vmatprep.mubr.msk.f32.mxu1 %vm939_vm0, %v3841_v29 }
 0x4f2   :  { %v2482_v13 = vpop.f32.mrb[18].mxu1 }
 0x4f3   :  { %v2844_v14 = vadd.f32 %v2482_v13, %v2468_v60  ;;  %v1366_v15 = vpop.f32.mrb[19].mxu1  ;;  %v1959_v13 = vld [vmem:[%s4016_s9] sm:$0xff] }
 0x4f4   :  { %v2845_v16 = vadd.f32 %v1366_v15, %v1200_v61 }
 0x4f5   :  { %v1382_v17 = vadd.f32 %v2844_v14, %v1380_v12  ;;  %v1960_v14 = vld [vmem:[%s4016_s9 + $0x8] sm:$0xff] }
 0x4f6   :  { %v1381_v18 = vadd.f32 %v2845_v16, %v1380_v12  ;;  %v2838_v15 = vpack.c.bf16 %v1960_v14, %v1959_v13 }
 0x4f7   :  { %v1384_v19 = vmax.f32 %v1382_v17, 0.0 }
 0x4f8   :  { %v1383_v20 = vmax.f32 %v1381_v18, 0.0 }
 0x4f9   :  { %v3925_v24 = vadd.f32 %v1386_v22, %v1384_v19 }
 0x4fa   :  { %v3923_v23 = vadd.f32 %v1385_v21, %v1383_v20 }
 0x4fb   :  { %v1653_v57 = vmul.f32 0.7, %v3925_v24 }
 0x4fc   :  { %2489 = vmatprep.mubr.msk.f32.mxu0 %vm1123_vm2, %v3923_v23  ;;  %v1652_v56 = vmul.f32 0.7, %v3923_v23 }
 0x4fd   :  { %2490 = vmatmul.mubr.msk.f32.vlgmr.msra.gmra.mrb[18].mxu0 %vm1123_vm2, %v3925_v24 }
 0x4fe   :  { %2829 = vmatpush3.bf16.msra.mxu0 %v2826_v40 }
 0x4ff   :  { %2510 = vmatprep.subr.msk.mxu0 %vm1130_vm1, %v1658_v43 }
 0x502   :  { %2511 = vmatpush3.msk.msra.mxu0 %vm1130_vm1, %v1658_v43 }
 0x5d0   :  { %v2491_v25 = vpop.f32.mrb[18].mxu0 }
 0x5d1   :  { %v1467_v26 = vpop.f32.mrb[19].mxu0 }
 0x5d2   :  { %v2889_v27 = vpack.i.bf16 %v2491_v25, %v1467_v26 }
 0x5d4   :  { %2890 = vrot.lane.b32.xlu1 %v2889_v27, %s2909_s24  ;;  %2885 = vrot.lane.b32.xlu0 %v2889_v27, %s2908_s23 }
 0x646   :  { %v2891_v28 = vpop.permute.xlu1 %2890  ;;  %v2886_v30 = vpop.permute.xlu0 %2885 }
 0x647   :  { %v2893_v31 = vunpack.i.h.bf16 %v2891_v28  ;;  %v2892_v32 = vunpack.i.l.bf16 %v2891_v28  ;;  %v2888_v33 = vunpack.i.h.bf16 %v2886_v30  ;;  %v2887_v34 = vunpack.i.l.bf16 %v2886_v30 }
 0x649   :  { %v2818_v35 = vpack.c.bf16 %v2888_v33, %v2887_v34  ;;  %v2822_v36 = vpack.c.bf16 %v2893_v31, %v2892_v32 }
 0x64b   :  { %2819 = vmatprep.subr.bf16.mxu1 %v2818_v35 }
 0x64c   :  { %2821 = vmatpush3.bf16.msra.mxu1 %v2818_v35 }
 0x64d   :  { %2823 = vmatprep.subr.bf16.mxu1 %v2822_v36 }
 0x64f   :  { %2497 = vmatmul.mubr.msk.f32.vlgmr.msra.gmra.mrb[20].mxu1 %vm939_vm0, %v3850_v39 }
 0x650   :  { %2825 = vmatpush3.bf16.msra.mxu1 %v2822_v36  ;;  %2503 = vmatprep.mubr.msk.f32.mxu1 %vm939_vm0, %v3855_v41 }
 0x651   :  { %2839 = vmatprep.subr.bf16.mxu1 %v2838_v15 }
 0x657   :  { %2504 = vmatmul.mubr.msk.f32.vlgmr.msra.gmra.mrb[20].mxu1 %vm939_vm0, %v3864_v42 }
 0x658   :  { %2841 = vmatpush3.bf16.msra.mxu1 %v2838_v15 }
 0x72a   :  { %v2505_v46 = vpop.f32.mrb[20].mxu1 }
 0x72b   :  { %v2846_v47 = vadd.f32 %v2505_v46, %v2491_v25  ;;  %v1633_v49 = vpop.f32.mrb[21].mxu1  ;;  %v2086_v46 = vld [vmem:[%s4017_s10] ss:$0 sm:$0xff] }
 0x72c   :  { %v2847_v51 = vadd.f32 %v1633_v49, %v1467_v26 }
 0x72d   :  { %v1649_v52 = vadd.f32 %v2846_v47, %v1647_v45 }
 0x72e   :  { %v1648_v53 = vadd.f32 %v2847_v51, %v1647_v45 }
 0x72f   :  { %v1651_v54 = vmax.f32 %v1649_v52, 0.0 }
 0x730   :  { %v1650_v55 = vmax.f32 %v1648_v53, 0.0 }
 0x731   :  { %v3956_v61 = vadd.f32 %v1653_v57, %v1651_v54 }
 0x732   :  { %v3954_v60 = vadd.f32 %v1652_v56, %v1650_v55 }
 0x733   :  { %v1920_v32 = vmul.f32 0.7, %v3956_v61 }
 0x734   :  { %2512 = vmatprep.mubr.msk.f32.mxu0 %vm1123_vm2, %v3954_v60  ;;  %v1919_v34 = vmul.f32 0.7, %v3954_v60 }
 0x735   :  { %2513 = vmatmul.mubr.msk.f32.vlgmr.msra.gmra.mrb[20].mxu0 %vm1123_vm2, %v3956_v61 }
 0x736   :  { %2519 = vmatprep.mubr.msk.f32.mxu0 %vm939_vm0, %v3841_v29  ;;  %v2913_v29 = vmov 3  }
 0x808   :  { %v2514_v0 = vpop.f32.mrb[20].mxu0 }
 0x809   :  { %v1734_v1 = vpop.f32.mrb[21].mxu0 }
 0x80a   :  { %v2899_v2 = vpack.i.bf16 %v2514_v0, %v1734_v1 }
 0x80c   :  { %2900 = vrot.lane.b32.xlu1 %v2899_v2, %s2909_s24  ;;  %2895 = vrot.lane.b32.xlu0 %v2899_v2, %s2908_s23 }
 0x810   :  { %1936 = vperm.xlu1 %2905, %v2085_v3   ;;  %1930 = vperm.xlu0 %2904, %v2085_v3  }
 0x814   :  { %2906 = vset.pattern.permute.xlu1 %v2912_v4  ;;  %2907 = vset.pattern.permute.xlu0 %v2913_v29 }
 0x815   :  { %1944 = vperm.xlu1 %2906, %v2085_v3   ;;  %1952 = vperm.xlu0 %2907, %v2085_v3  }
 0x87e   :  { %v2901_v5 = vpop.permute.xlu1 %2900  ;;  %v2896_v6 = vpop.permute.xlu0 %2895 }
 0x87f   :  { %v2903_v7 = vunpack.i.h.bf16 %v2901_v5  ;;  %v2902_v8 = vunpack.i.l.bf16 %v2901_v5  ;;  %v2898_v9 = vunpack.i.h.bf16 %v2896_v6  ;;  %v2897_v10 = vunpack.i.l.bf16 %v2896_v6 }
 0x881   :  { %v2830_v11 = vpack.c.bf16 %v2898_v9, %v2897_v10  ;;  %v2834_v12 = vpack.c.bf16 %v2903_v7, %v2902_v8 }
 0x883   :  { %2831 = vmatprep.subr.bf16.mxu0 %v2830_v11 }
 0x884   :  { %2833 = vmatpush3.bf16.msra.mxu0 %v2830_v11 }
 0x885   :  { %2835 = vmatprep.subr.bf16.mxu0 %v2834_v12 }
 0x887   :  { %2520 = vmatmul.mubr.msk.f32.vlgmr.msra.gmra.mrb[22].mxu0 %vm939_vm0, %v3850_v39  ;;  %v1961_v39 = vld [vmem:[%s4016_s9 + $0x10] sm:$0xf] }
 0x888   :  { %2837 = vmatpush3.bf16.msra.mxu0 %v2834_v12  ;;  %2526 = vmatprep.mubr.msk.f32.mxu0 %vm939_vm0, %v3855_v41  ;;  %v1913_v41 = vsub.s32 3, %v3879_v48 }
 0x889   :  { %2533 = vmatprep.subr.msk.mxu1 %vm1130_vm1, %v1961_v39 }
 0x88a   :  { %2534 = vmatpush3.msk.msra.mxu1 %vm1130_vm1, %v1961_v39  ;;  %v1914_v16 = vrot.slane %v3885_v50, %v1913_v41 }
 0x88f   :  { %2527 = vmatmul.mubr.msk.f32.vlgmr.msra.gmra.mrb[22].mxu0 %vm939_vm0, %v3864_v42  ;;  %v1937_v42 = vpop.permute.xlu1 %1936  ;;  %v1931_v18 = vpop.permute.xlu0 %1930 }
 0x890   :  { %v1939_v26 = vmul.f32 %v1937_v42, %v3923_v23  ;;  %v1933_v27 = vmul.f32 %v1931_v18, %v3888_v58  ;;  %v1940_v30 = vmul.f32 %v1937_v42, %v3925_v24  ;;  %v1934_v31 = vmul.f32 %v1931_v18, %v3890_v59 }
 0x892   :  { %v1941_v23 = vadd.f32 %v1939_v26, %v1933_v27  ;;  %v1942_v58 = vadd.f32 %v1940_v30, %v1934_v31 }
 0x894   :  { %v1945_v22 = vpop.permute.xlu1 %1944  ;;  %v1953_v35 = vpop.permute.xlu0 %1952 }
 0x895   :  { %v1947_v50 = vmul.f32 %v1945_v22, %v3954_v60  ;;  %v1948_v36 = vmul.f32 %v1945_v22, %v3956_v61 }
 0x897   :  { %v1949_v43 = vadd.f32 %v1947_v50, %v1941_v23  ;;  %v1950_v44 = vadd.f32 %v1948_v36, %v1942_v58 }
 0x962   :  { %v2528_v17 = vpop.f32.mrb[22].mxu0 }
 0x963   :  { %v2848_v19 = vadd.f32 %v2528_v17, %v2514_v0  ;;  %v1900_v20 = vpop.f32.mrb[23].mxu0 }
 0x964   :  { %v2849_v21 = vadd.f32 %v1900_v20, %v1734_v1 }
 0x965   :  { %v1916_v25 = vadd.f32 %v2848_v19, %v1914_v16 }
 0x966   :  { %v1915_v28 = vadd.f32 %v2849_v21, %v1914_v16 }
 0x967   :  { %v1918_v48 = vmax.f32 %v1916_v25, 0.0 }
 0x968   :  { %v1917_v33 = vmax.f32 %v1915_v28, 0.0 }
 0x969   :  { %v1922_v37 = vadd.f32 %v1920_v32, %v1918_v48 }
 0x96a   :  { %v1921_v38 = vadd.f32 %v1919_v34, %v1917_v33 }
 0x96b   :  { %v1956_v40 = vmul.f32 %v1953_v35, %v1922_v37 }
 0x96c   :  { %v1955_v24 = vmul.f32 %v1953_v35, %v1921_v38 }
 0x96d   :  { %v1958_v45 = vadd.f32 %v1956_v40, %v1950_v44 }
 0x96e   :  { %v1957_v59 = vadd.f32 %v1955_v24, %v1949_v43 }
 0x970   :  { %2535 = vmatprep.mubr.msk.f32.mxu1 %vm1123_vm2, %v1957_v59 }
 0x971   :  { %2536 = vmatmul.mubr.msk.f32.vlgmr.msra.gmra.mrb[22].mxu1 %vm1123_vm2, %v1958_v45 }
 0xa44   :  { %v2537_v47 = vpop.f32.mrb[22].mxu1 }
 0xa45   :  { %v2050_v49 = vadd.f32 %v2537_v47, %v2086_v46  ;;  %v2044_v51 = vpop.f32.mrb[23].mxu1 }
 0xa46   :  { %v2045_v52 = vadd.f32 %v2086_v46, %v2044_v51 }
 0xa47   :  { %2055 = vst.msk [vmem:[%s4018_s11 + $0x8] sm:$0xff] %vm2053_vm3, %v2050_v49 }
 0xa48   :  { %2054 = vst.msk [vmem:[%s4018_s11] sm:$0xff] %vm2053_vm3, %v2045_v52 }

</bundles_post_ra>
